<compile_context>
chip_gen: v7x
topology: tpu7x:2x2x1
jax: 0.10.0
libtpu: 0.0.40
codegen_flags: <defaults>
</compile_context>

<pallas_src>
import functools
import math

import jax
import jax.numpy as jnp
from jax.experimental import pallas as pl
from jax.experimental.pallas import tpu as pltpu


# ----------------------------------------------------------------------------
# Geometry helper (mirrors the PyTorch calc_out_length)
# ----------------------------------------------------------------------------
def calc_out_length(l_in, kernel_lengths, stride=1, dilation=1, padding=0):
    l_out = l_in
    for kernel in kernel_lengths:
        l_out = math.floor(
            (l_out + 2 * padding - dilation * (kernel - 1) - 1) / stride + 1)
    return l_out


# ----------------------------------------------------------------------------
# The single fused kernel: conv stack + handoff + fused FC heads
# ----------------------------------------------------------------------------
def _fused_kernel(x_ref, *refs, n_conv, n_fc, offsets_per_layer, n_batch,
                  s_spatial):
    # refs layout:
    #   [w_conv0, b_conv0, ..., w_fc0, b_fc0, ...]  (2*(n_conv+n_fc) inputs)
    #   o_ref
    #   slab scratch per conv layer, then feats scratch
    n_in = 2 * (n_conv + n_fc)
    o_ref = refs[n_in]
    slab_refs = refs[n_in + 1:n_in + 1 + n_conv]
    feats_ref = refs[n_in + 1 + n_conv]
    ns = n_batch * s_spatial

    # ---------------- conv stack (channels-major, stacked-K matmuls) --------
    act = x_ref[...]                                     # (C0, N*S) f32
    for l in range(n_conv):
        w_ref, b_ref = refs[2 * l], refs[2 * l + 1]      # (Cout, taps*Cin) bf16
        slab_ref = slab_refs[l]                          # (taps*Cin, N*S) f32
        cin = act.shape[0]
        for t, d in enumerate(offsets_per_layer[l]):
            # shifted view along lanes: slab[t*Cin+ci, p] = act[ci, p + d]
            piece = act if d == 0 else pltpu.roll(act, shift=ns - d, axis=1)
            slab_ref[t * cin:(t + 1) * cin, :] = piece
        y = jnp.dot(w_ref[...], slab_ref[...].astype(jnp.bfloat16),
                    preferred_element_type=jnp.float32)  # (Cout, N*S) f32
        act = jnp.maximum(y + b_ref[...], 0.0)           # bias + ReLU in f32

    # ------------- handoff: (Cf, N*S) channels-major -> (N, Cf*S) rows ------
    # Lane-aligned 128-multiple copies only (S = H*W = 256 here).
    cf = act.shape[0]
    for n in range(n_batch):
        for c in range(cf):
            feats_ref[n:n + 1, c * s_spatial:(c + 1) * s_spatial] = \
                act[c:c + 1, n * s_spatial:(n + 1) * s_spatial]

    # ---------------- fused FC: class head + domain head, all layers --------
    # GradientReversalFn is the identity in the forward pass, so both heads
    # consume the same VMEM-resident features.
    z = feats_ref[...].astype(jnp.bfloat16)              # (N, Cf*S)
    for l in range(n_fc):
        w_ref = refs[2 * (n_conv + l)]
        b_ref = refs[2 * (n_conv + l) + 1]
        acc = jnp.dot(z, w_ref[...],
                      preferred_element_type=jnp.float32) + b_ref[...]
        if l < n_fc - 1:
            z = jnp.maximum(acc, 0.0).astype(jnp.bfloat16)
        else:
            o_ref[...] = acc                             # last layer: no ReLU


# ----------------------------------------------------------------------------
# Forward pass (matches Image_Classifier_inc_Domain_Adaptation.forward)
# ----------------------------------------------------------------------------
def forward(params, x_nchw, grl_lambda=1.0):
    del grl_lambda                     # identity in the forward pass
    n, c0, in_h, in_w = x_nchw.shape
    s = in_h * in_w
    ns = n * s
    conv_params = params["conv"]
    fc_params = params["fc"]

    # Recover the (static) conv kernel sizes from the prepared weight shapes.
    ks = []
    c_prev = c0
    for w, _ in conv_params:
        ks.append(int(round(math.sqrt(w.shape[1] // c_prev))))
        c_prev = w.shape[0]
    offsets_per_layer = tuple(
        tuple(dh * in_w + dw for dh in range(k) for dw in range(k)) for k in ks)
    cf = conv_params[-1][0].shape[0]
    out_dim = fc_params[-1][0].shape[1]

    # Channels-major canvas with the batch folded into the lane axis.
    canvas = jnp.transpose(x_nchw, (1, 0, 2, 3)).reshape(c0, ns)
    canvas = canvas.astype(jnp.float32)

    args = [canvas]
    for w, b in conv_params:
        args += [w, b]
    for w, b in fc_params:
        args += [w, b]

    scratch_defs = [((w.shape[1], ns), jnp.float32) for w, _ in conv_params]
    scratch_defs.append(((n, cf * s), jnp.float32))
    scratch_shapes = [pltpu.VMEM(shape, dt) for shape, dt in scratch_defs]

    # VMEM budget guard (v7x: 64 MiB physical / 32 MiB default scoped).
    vmem_bytes = sum(int(a.size) * a.dtype.itemsize for a in args)
    vmem_bytes += sum(math.prod(shape) * 4 for shape, _ in scratch_defs)
    vmem_bytes += n * out_dim * 4
    assert vmem_bytes < 24 * 1024 * 1024, (
        "fused kernel exceeds the conservative VMEM budget; "
        "K-tile the first FC weight (see TODO at file top)")

    vmem = pl.BlockSpec(memory_space=pltpu.MemorySpace.VMEM)
    out = pl.pallas_call(
        functools.partial(_fused_kernel,
                          n_conv=len(conv_params), n_fc=len(fc_params),
                          offsets_per_layer=offsets_per_layer,
                          n_batch=n, s_spatial=s),
        out_shape=jax.ShapeDtypeStruct((n, out_dim), jnp.float32),
        in_specs=[vmem] * len(args),
        out_specs=vmem,
        scratch_shapes=scratch_shapes,
    )(*args)

    half = out_dim // 2
    return out[:, :half], out[:, half:]        # class_pred, domain_pred


# ----------------------------------------------------------------------------
# Parameters: synthetic init in PyTorch layout, then one-time conversion into
# the kernel-ready fused / permuted layout.
# ----------------------------------------------------------------------------
def init_torch_style_params(key, in_channels, hidden_channels, kernel_sizes,
                            in_h, in_w, fc_hidden_dims):
    params = {"conv": [], "class_fc": [], "domain_fc": []}
    n_keys = 2 * len(hidden_channels) + 2 * 2 * (len(fc_hidden_dims) + 1)
    keys = iter(jax.random.split(key, n_keys))

    cin = in_channels
    for cout, k in zip(hidden_channels, kernel_sizes):
        bound = 1.0 / math.sqrt(cin * k * k)
        wgt = jax.random.uniform(next(keys), (cout, cin, k, k), jnp.float32,
                                 -bound, bound)
        bias = jax.random.uniform(next(keys), (cout,), jnp.float32, -bound, bound)
        params["conv"].append((wgt, bias))
        cin = cout

    out_h = calc_out_length(in_h, kernel_sizes)
    out_w = calc_out_length(in_w, kernel_sizes)
    in_dim = hidden_channels[-1] * out_h * out_w
    for name in ("class_fc", "domain_fc"):
        d = in_dim
        for out_dim in list(fc_hidden_dims) + [1]:
            bound = 1.0 / math.sqrt(d)
            wgt = jax.random.uniform(next(keys), (out_dim, d), jnp.float32,
                                     -bound, bound)
            bias = jax.random.uniform(next(keys), (out_dim,), jnp.float32,
                                      -bound, bound)
            params[name].append((wgt, bias))
            d = out_dim
    return params


def prepare_params(torch_params, kernel_sizes, in_h, in_w):
    """One-time conversion of PyTorch-layout params into kernel-ready form."""
    conv = []
    for wgt, bias in torch_params["conv"]:
        cout, cin, kh, kw = wgt.shape
        # column order = (dh*kw + dw)*Cin + ci, matching the in-kernel slab
        w = jnp.transpose(wgt, (0, 2, 3, 1)).reshape(cout, kh * kw * cin)
        conv.append((w.astype(jnp.bfloat16),
                     bias.reshape(cout, 1).astype(jnp.float32)))

    cf = torch_params["conv"][-1][0].shape[0]
    hout = calc_out_length(in_h, kernel_sizes)
    wout = calc_out_length(in_w, kernel_sizes)
    s = in_h * in_w

    def to_canvas_cols(w_pt):
        # (out, Cf*hout*wout) PyTorch (C,H,W) flatten -> (Cf*S, out) with
        # exact-zero rows for out-of-window spatial positions (these rows also
        # neutralize the roll-wraparound garbage of invalid canvas positions).
        out_dim = w_pt.shape[0]
        w4 = w_pt.reshape(out_dim, cf, hout, wout)
        w4 = jnp.pad(w4, ((0, 0), (0, 0), (0, in_h - hout), (0, in_w - wout)))
        return w4.reshape(out_dim, cf * s).T

    fc = []
    n_fc = len(torch_params["class_fc"])
    for l in range(n_fc):
        wc, bc = torch_params["class_fc"][l]
        wd, bd = torch_params["domain_fc"][l]
        if l == 0:   # shared features: concatenate heads along the output axis
            w_f = jnp.concatenate([to_canvas_cols(wc), to_canvas_cols(wd)],
                                  axis=1)
        else:        # independent heads: block-diagonal fused weight
            wc_t, wd_t = wc.T, wd.T
            top = jnp.concatenate(
                [wc_t, jnp.zeros((wc_t.shape[0], wd_t.shape[1]), wc_t.dtype)],
                axis=1)
            bot = jnp.concatenate(
                [jnp.zeros((wd_t.shape[0], wc_t.shape[1]), wd_t.dtype), wd_t],
                axis=1)
            w_f = jnp.concatenate([top, bot], axis=0)
        b_f = jnp.concatenate([bc, bd]).reshape(1, -1)
        fc.append((w_f.astype(jnp.bfloat16), b_f.astype(jnp.float32)))

    return {"conv": conv, "fc": fc}


# ----------------------------------------------------------------------------
# Pure-JAX reference (f32) for a tolerance check of the mixed-precision kernel
# ----------------------------------------------------------------------------
def reference_forward(torch_params, x):
    h = x
    for w, b in torch_params["conv"]:
        h = jax.lax.conv_general_dilated(
            h, w, window_strides=(1, 1), padding="VALID",
            dimension_numbers=("NCHW", "OIHW", "NCHW"))
        h = jnp.maximum(h + b.reshape(1, -1, 1, 1), 0.0)
    feats = h.reshape(x.shape[0], -1)

    def head(layers):
        z = feats
        for i, (w, b) in enumerate(layers):
            z = z @ w.T + b
            if i < len(layers) - 1:
                z = jnp.maximum(z, 0.0)
        return z

    return head(torch_params["class_fc"]), head(torch_params["domain_fc"])


if __name__ == "__main__":
    key = jax.random.PRNGKey(0)
    k_x, k_p = jax.random.split(key)

    # Small config consistent with the module: 2 conv layers + 1 hidden FC dim.
    in_channels = 4
    hidden_channels = [8, 16]
    kernel_sizes = [3, 3]
    in_h = in_w = 16
    fc_hidden_dims = [32]

    x = jax.random.normal(k_x, (2, in_channels, in_h, in_w), jnp.float32)  # NCHW
    torch_params = init_torch_style_params(k_p, in_channels, hidden_channels,
                                           kernel_sizes, in_h, in_w,
                                           fc_hidden_dims)
    params = prepare_params(torch_params, kernel_sizes, in_h, in_w)

    class_pred, domain_pred = jax.jit(forward)(params, x)
    jax.block_until_ready((class_pred, domain_pred))

    assert class_pred.shape == (2, 1), class_pred.shape
    assert domain_pred.shape == (2, 1), domain_pred.shape

    # Mixed-precision (bf16 MXU operands, f32 accumulation) tolerance check.
    ref_c, ref_d = reference_forward(torch_params, x)
    assert bool(jnp.allclose(class_pred, ref_c, rtol=5e-2, atol=5e-2)), (
        class_pred, ref_c)
    assert bool(jnp.allclose(domain_pred, ref_d, rtol=5e-2, atol=5e-2)), (
        domain_pred, ref_d)

    print("KERNEL_OK")
</pallas_src>

<mosaic_0001>
module attributes {stable_mosaic.version = 11 : i64} {
  func.func @_fused_kernel(%arg0: memref<4x512xf32, #tpu.memory_space<vmem>>, %arg1: memref<8x36xbf16, #tpu.memory_space<vmem>>, %arg2: memref<8x1xf32, #tpu.memory_space<vmem>>, %arg3: memref<16x72xbf16, #tpu.memory_space<vmem>>, %arg4: memref<16x1xf32, #tpu.memory_space<vmem>>, %arg5: memref<4096x64xbf16, #tpu.memory_space<vmem>>, %arg6: memref<1x64xf32, #tpu.memory_space<vmem>>, %arg7: memref<64x2xbf16, #tpu.memory_space<vmem>>, %arg8: memref<1x2xf32, #tpu.memory_space<vmem>>, %arg9: memref<2x2xf32, #tpu.memory_space<vmem>>, %arg10: memref<36x512xf32, #tpu.memory_space<vmem>>, %arg11: memref<72x512xf32, #tpu.memory_space<vmem>>, %arg12: memref<2x4096xf32, #tpu.memory_space<vmem>>) attributes {dimension_semantics = [], scalar_prefetch = 0 : i64, scratch_operands = 3 : i64, tpu.core_type = #tpu.core_type<tc>} {
    %c0 = arith.constant 0 : index
    %c0_0 = arith.constant 0 : index
    %0 = vector.load %arg0[%c0, %c0_0] : memref<4x512xf32, #tpu.memory_space<vmem>>, vector<4x512xf32>
    %c0_1 = arith.constant 0 : index
    %c0_2 = arith.constant 0 : index
    %1 = vector.load %arg10[%c0_1, %c0_2] : memref<36x512xf32, #tpu.memory_space<vmem>>, vector<4x512xf32>
    tpu.vector_store %arg10[%c0_1, %c0_2], %0 {strides = array<i32>} : memref<36x512xf32, #tpu.memory_space<vmem>>, vector<4x512xf32>,
    %c511_i32 = arith.constant 511 : i32
    %2 = tpu.dynamic_rotate %0 by %c511_i32 dim 1 : vector<4x512xf32>, i32 -> vector<4x512xf32>
    %c4 = arith.constant 4 : index
    %c0_3 = arith.constant 0 : index
    %3 = vector.load %arg10[%c4, %c0_3] : memref<36x512xf32, #tpu.memory_space<vmem>>, vector<4x512xf32>
    tpu.vector_store %arg10[%c4, %c0_3], %2 {strides = array<i32>} : memref<36x512xf32, #tpu.memory_space<vmem>>, vector<4x512xf32>,
    %c510_i32 = arith.constant 510 : i32
    %4 = tpu.dynamic_rotate %0 by %c510_i32 dim 1 : vector<4x512xf32>, i32 -> vector<4x512xf32>
    %c8 = arith.constant 8 : index
    %c0_4 = arith.constant 0 : index
    %5 = vector.load %arg10[%c8, %c0_4] : memref<36x512xf32, #tpu.memory_space<vmem>>, vector<4x512xf32>
    tpu.vector_store %arg10[%c8, %c0_4], %4 {strides = array<i32>} : memref<36x512xf32, #tpu.memory_space<vmem>>, vector<4x512xf32>,
    %c496_i32 = arith.constant 496 : i32
    %6 = tpu.dynamic_rotate %0 by %c496_i32 dim 1 : vector<4x512xf32>, i32 -> vector<4x512xf32>
    %c12 = arith.constant 12 : index
    %c0_5 = arith.constant 0 : index
    %7 = vector.load %arg10[%c12, %c0_5] : memref<36x512xf32, #tpu.memory_space<vmem>>, vector<4x512xf32>
    tpu.vector_store %arg10[%c12, %c0_5], %6 {strides = array<i32>} : memref<36x512xf32, #tpu.memory_space<vmem>>, vector<4x512xf32>,
    %c495_i32 = arith.constant 495 : i32
    %8 = tpu.dynamic_rotate %0 by %c495_i32 dim 1 : vector<4x512xf32>, i32 -> vector<4x512xf32>
    %c16 = arith.constant 16 : index
    %c0_6 = arith.constant 0 : index
    %9 = vector.load %arg10[%c16, %c0_6] : memref<36x512xf32, #tpu.memory_space<vmem>>, vector<4x512xf32>
    tpu.vector_store %arg10[%c16, %c0_6], %8 {strides = array<i32>} : memref<36x512xf32, #tpu.memory_space<vmem>>, vector<4x512xf32>,
    %c494_i32 = arith.constant 494 : i32
    %10 = tpu.dynamic_rotate %0 by %c494_i32 dim 1 : vector<4x512xf32>, i32 -> vector<4x512xf32>
    %c20 = arith.constant 20 : index
    %c0_7 = arith.constant 0 : index
    %11 = vector.load %arg10[%c20, %c0_7] : memref<36x512xf32, #tpu.memory_space<vmem>>, vector<4x512xf32>
    tpu.vector_store %arg10[%c20, %c0_7], %10 {strides = array<i32>} : memref<36x512xf32, #tpu.memory_space<vmem>>, vector<4x512xf32>,
    %c480_i32 = arith.constant 480 : i32
    %12 = tpu.dynamic_rotate %0 by %c480_i32 dim 1 : vector<4x512xf32>, i32 -> vector<4x512xf32>
    %c24 = arith.constant 24 : index
    %c0_8 = arith.constant 0 : index
    %13 = vector.load %arg10[%c24, %c0_8] : memref<36x512xf32, #tpu.memory_space<vmem>>, vector<4x512xf32>
    tpu.vector_store %arg10[%c24, %c0_8], %12 {strides = array<i32>} : memref<36x512xf32, #tpu.memory_space<vmem>>, vector<4x512xf32>,
    %c479_i32 = arith.constant 479 : i32
    %14 = tpu.dynamic_rotate %0 by %c479_i32 dim 1 : vector<4x512xf32>, i32 -> vector<4x512xf32>
    %c28 = arith.constant 28 : index
    %c0_9 = arith.constant 0 : index
    %15 = vector.load %arg10[%c28, %c0_9] : memref<36x512xf32, #tpu.memory_space<vmem>>, vector<4x512xf32>
    tpu.vector_store %arg10[%c28, %c0_9], %14 {strides = array<i32>} : memref<36x512xf32, #tpu.memory_space<vmem>>, vector<4x512xf32>,
    %c478_i32 = arith.constant 478 : i32
    %16 = tpu.dynamic_rotate %0 by %c478_i32 dim 1 : vector<4x512xf32>, i32 -> vector<4x512xf32>
    %c32 = arith.constant 32 : index
    %c0_10 = arith.constant 0 : index
    %17 = vector.load %arg10[%c32, %c0_10] : memref<36x512xf32, #tpu.memory_space<vmem>>, vector<4x512xf32>
    tpu.vector_store %arg10[%c32, %c0_10], %16 {strides = array<i32>} : memref<36x512xf32, #tpu.memory_space<vmem>>, vector<4x512xf32>,
    %c0_11 = arith.constant 0 : index
    %c0_12 = arith.constant 0 : index
    %18 = vector.load %arg1[%c0_11, %c0_12] : memref<8x36xbf16, #tpu.memory_space<vmem>>, vector<8x36xbf16>
    %c0_13 = arith.constant 0 : index
    %c0_14 = arith.constant 0 : index
    %19 = vector.load %arg10[%c0_13, %c0_14] : memref<36x512xf32, #tpu.memory_space<vmem>>, vector<36x512xf32>
    %20 = arith.truncf %19 : vector<36x512xf32> to vector<36x512xbf16>
    %cst = arith.constant dense<0.000000e+00> : vector<8x512xf32>
    %21 = tpu.matmul %18, %20, %cst {dimension_numbers = #tpu.dot_dimension_numbers<[1], [0], [0], [1], [0, 0, 1, 1], [], []>} : vector<8x36xbf16>, vector<36x512xbf16>, vector<8x512xf32> -> vector<8x512xf32>
    %c0_15 = arith.constant 0 : index
    %c0_16 = arith.constant 0 : index
    %22 = vector.load %arg2[%c0_15, %c0_16] : memref<8x1xf32, #tpu.memory_space<vmem>>, vector<8x1xf32>
    %23 = vector.broadcast %22 : vector<8x1xf32> to vector<8x512xf32>
    %24 = arith.addf %21, %23 : vector<8x512xf32>
    %cst_17 = arith.constant 0.000000e+00 : f32
    %25 = vector.broadcast %cst_17 : f32 to vector<8x512xf32>
    %26 = arith.maximumf %24, %25 : vector<8x512xf32>
    %c0_18 = arith.constant 0 : index
    %c0_19 = arith.constant 0 : index
    %27 = vector.load %arg11[%c0_18, %c0_19] : memref<72x512xf32, #tpu.memory_space<vmem>>, vector<8x512xf32>
    tpu.vector_store %arg11[%c0_18, %c0_19], %26 {strides = array<i32>} : memref<72x512xf32, #tpu.memory_space<vmem>>, vector<8x512xf32>,
    %c511_i32_20 = arith.constant 511 : i32
    %28 = tpu.dynamic_rotate %26 by %c511_i32_20 dim 1 : vector<8x512xf32>, i32 -> vector<8x512xf32>
    %c8_21 = arith.constant 8 : index
    %c0_22 = arith.constant 0 : index
    %29 = vector.load %arg11[%c8_21, %c0_22] : memref<72x512xf32, #tpu.memory_space<vmem>>, vector<8x512xf32>
    tpu.vector_store %arg11[%c8_21, %c0_22], %28 {strides = array<i32>} : memref<72x512xf32, #tpu.memory_space<vmem>>, vector<8x512xf32>,
    %c510_i32_23 = arith.constant 510 : i32
    %30 = tpu.dynamic_rotate %26 by %c510_i32_23 dim 1 : vector<8x512xf32>, i32 -> vector<8x512xf32>
    %c16_24 = arith.constant 16 : index
    %c0_25 = arith.constant 0 : index
    %31 = vector.load %arg11[%c16_24, %c0_25] : memref<72x512xf32, #tpu.memory_space<vmem>>, vector<8x512xf32>
    tpu.vector_store %arg11[%c16_24, %c0_25], %30 {strides = array<i32>} : memref<72x512xf32, #tpu.memory_space<vmem>>, vector<8x512xf32>,
    %c496_i32_26 = arith.constant 496 : i32
    %32 = tpu.dynamic_rotate %26 by %c496_i32_26 dim 1 : vector<8x512xf32>, i32 -> vector<8x512xf32>
    %c24_27 = arith.constant 24 : index
    %c0_28 = arith.constant 0 : index
    %33 = vector.load %arg11[%c24_27, %c0_28] : memref<72x512xf32, #tpu.memory_space<vmem>>, vector<8x512xf32>
    tpu.vector_store %arg11[%c24_27, %c0_28], %32 {strides = array<i32>} : memref<72x512xf32, #tpu.memory_space<vmem>>, vector<8x512xf32>,
    %c495_i32_29 = arith.constant 495 : i32
    %34 = tpu.dynamic_rotate %26 by %c495_i32_29 dim 1 : vector<8x512xf32>, i32 -> vector<8x512xf32>
    %c32_30 = arith.constant 32 : index
    %c0_31 = arith.constant 0 : index
    %35 = vector.load %arg11[%c32_30, %c0_31] : memref<72x512xf32, #tpu.memory_space<vmem>>, vector<8x512xf32>
    tpu.vector_store %arg11[%c32_30, %c0_31], %34 {strides = array<i32>} : memref<72x512xf32, #tpu.memory_space<vmem>>, vector<8x512xf32>,
    %c494_i32_32 = arith.constant 494 : i32
    %36 = tpu.dynamic_rotate %26 by %c494_i32_32 dim 1 : vector<8x512xf32>, i32 -> vector<8x512xf32>
    %c40 = arith.constant 40 : index
    %c0_33 = arith.constant 0 : index
    %37 = vector.load %arg11[%c40, %c0_33] : memref<72x512xf32, #tpu.memory_space<vmem>>, vector<8x512xf32>
    tpu.vector_store %arg11[%c40, %c0_33], %36 {strides = array<i32>} : memref<72x512xf32, #tpu.memory_space<vmem>>, vector<8x512xf32>,
    %c480_i32_34 = arith.constant 480 : i32
    %38 = tpu.dynamic_rotate %26 by %c480_i32_34 dim 1 : vector<8x512xf32>, i32 -> vector<8x512xf32>
    %c48 = arith.constant 48 : index
    %c0_35 = arith.constant 0 : index
    %39 = vector.load %arg11[%c48, %c0_35] : memref<72x512xf32, #tpu.memory_space<vmem>>, vector<8x512xf32>
    tpu.vector_store %arg11[%c48, %c0_35], %38 {strides = array<i32>} : memref<72x512xf32, #tpu.memory_space<vmem>>, vector<8x512xf32>,
    %c479_i32_36 = arith.constant 479 : i32
    %40 = tpu.dynamic_rotate %26 by %c479_i32_36 dim 1 : vector<8x512xf32>, i32 -> vector<8x512xf32>
    %c56 = arith.constant 56 : index
    %c0_37 = arith.constant 0 : index
    %41 = vector.load %arg11[%c56, %c0_37] : memref<72x512xf32, #tpu.memory_space<vmem>>, vector<8x512xf32>
    tpu.vector_store %arg11[%c56, %c0_37], %40 {strides = array<i32>} : memref<72x512xf32, #tpu.memory_space<vmem>>, vector<8x512xf32>,
    %c478_i32_38 = arith.constant 478 : i32
    %42 = tpu.dynamic_rotate %26 by %c478_i32_38 dim 1 : vector<8x512xf32>, i32 -> vector<8x512xf32>
    %c64 = arith.constant 64 : index
    %c0_39 = arith.constant 0 : index
    %43 = vector.load %arg11[%c64, %c0_39] : memref<72x512xf32, #tpu.memory_space<vmem>>, vector<8x512xf32>
    tpu.vector_store %arg11[%c64, %c0_39], %42 {strides = array<i32>} : memref<72x512xf32, #tpu.memory_space<vmem>>, vector<8x512xf32>,
    %c0_40 = arith.constant 0 : index
    %c0_41 = arith.constant 0 : index
    %44 = vector.load %arg3[%c0_40, %c0_41] : memref<16x72xbf16, #tpu.memory_space<vmem>>, vector<16x72xbf16>
    %c0_42 = arith.constant 0 : index
    %c0_43 = arith.constant 0 : index
    %45 = vector.load %arg11[%c0_42, %c0_43] : memref<72x512xf32, #tpu.memory_space<vmem>>, vector<72x512xf32>
    %46 = arith.truncf %45 : vector<72x512xf32> to vector<72x512xbf16>
    %cst_44 = arith.constant dense<0.000000e+00> : vector<16x512xf32>
    %47 = tpu.matmul %44, %46, %cst_44 {dimension_numbers = #tpu.dot_dimension_numbers<[1], [0], [0], [1], [0, 0, 1, 1], [], []>} : vector<16x72xbf16>, vector<72x512xbf16>, vector<16x512xf32> -> vector<16x512xf32>
    %c0_45 = arith.constant 0 : index
    %c0_46 = arith.constant 0 : index
    %48 = vector.load %arg4[%c0_45, %c0_46] : memref<16x1xf32, #tpu.memory_space<vmem>>, vector<16x1xf32>
    %49 = vector.broadcast %48 : vector<16x1xf32> to vector<16x512xf32>
    %50 = arith.addf %47, %49 : vector<16x512xf32>
    %cst_47 = arith.constant 0.000000e+00 : f32
    %51 = vector.broadcast %cst_47 : f32 to vector<16x512xf32>
    %52 = arith.maximumf %50, %51 : vector<16x512xf32>
    %53 = vector.extract_strided_slice %52 {offsets = [0, 0], sizes = [1, 256], strides = [1, 1]} : vector<16x512xf32> to vector<1x256xf32>
    %c0_48 = arith.constant 0 : index
    %c0_49 = arith.constant 0 : index
    %54 = vector.load %arg12[%c0_48, %c0_49] : memref<2x4096xf32, #tpu.memory_space<vmem>>, vector<1x256xf32>
    tpu.vector_store %arg12[%c0_48, %c0_49], %53 {strides = array<i32>} : memref<2x4096xf32, #tpu.memory_space<vmem>>, vector<1x256xf32>,
    %55 = vector.extract_strided_slice %52 {offsets = [1, 0], sizes = [1, 256], strides = [1, 1]} : vector<16x512xf32> to vector<1x256xf32>
    %c0_50 = arith.constant 0 : index
    %c256 = arith.constant 256 : index
    %56 = vector.load %arg12[%c0_50, %c256] : memref<2x4096xf32, #tpu.memory_space<vmem>>, vector<1x256xf32>
    tpu.vector_store %arg12[%c0_50, %c256], %55 {strides = array<i32>} : memref<2x4096xf32, #tpu.memory_space<vmem>>, vector<1x256xf32>,
    %57 = vector.extract_strided_slice %52 {offsets = [2, 0], sizes = [1, 256], strides = [1, 1]} : vector<16x512xf32> to vector<1x256xf32>
    %c0_51 = arith.constant 0 : index
    %c512 = arith.constant 512 : index
    %58 = vector.load %arg12[%c0_51, %c512] : memref<2x4096xf32, #tpu.memory_space<vmem>>, vector<1x256xf32>
    tpu.vector_store %arg12[%c0_51, %c512], %57 {strides = array<i32>} : memref<2x4096xf32, #tpu.memory_space<vmem>>, vector<1x256xf32>,
    %59 = vector.extract_strided_slice %52 {offsets = [3, 0], sizes = [1, 256], strides = [1, 1]} : vector<16x512xf32> to vector<1x256xf32>
    %c0_52 = arith.constant 0 : index
    %c768 = arith.constant 768 : index
    %60 = vector.load %arg12[%c0_52, %c768] : memref<2x4096xf32, #tpu.memory_space<vmem>>, vector<1x256xf32>
    tpu.vector_store %arg12[%c0_52, %c768], %59 {strides = array<i32>} : memref<2x4096xf32, #tpu.memory_space<vmem>>, vector<1x256xf32>,
    %61 = vector.extract_strided_slice %52 {offsets = [4, 0], sizes = [1, 256], strides = [1, 1]} : vector<16x512xf32> to vector<1x256xf32>
    %c0_53 = arith.constant 0 : index
    %c1024 = arith.constant 1024 : index
    %62 = vector.load %arg12[%c0_53, %c1024] : memref<2x4096xf32, #tpu.memory_space<vmem>>, vector<1x256xf32>
    tpu.vector_store %arg12[%c0_53, %c1024], %61 {strides = array<i32>} : memref<2x4096xf32, #tpu.memory_space<vmem>>, vector<1x256xf32>,
    %63 = vector.extract_strided_slice %52 {offsets = [5, 0], sizes = [1, 256], strides = [1, 1]} : vector<16x512xf32> to vector<1x256xf32>
    %c0_54 = arith.constant 0 : index
    %c1280 = arith.constant 1280 : index
    %64 = vector.load %arg12[%c0_54, %c1280] : memref<2x4096xf32, #tpu.memory_space<vmem>>, vector<1x256xf32>
    tpu.vector_store %arg12[%c0_54, %c1280], %63 {strides = array<i32>} : memref<2x4096xf32, #tpu.memory_space<vmem>>, vector<1x256xf32>,
    %65 = vector.extract_strided_slice %52 {offsets = [6, 0], sizes = [1, 256], strides = [1, 1]} : vector<16x512xf32> to vector<1x256xf32>
    %c0_55 = arith.constant 0 : index
    %c1536 = arith.constant 1536 : index
    %66 = vector.load %arg12[%c0_55, %c1536] : memref<2x4096xf32, #tpu.memory_space<vmem>>, vector<1x256xf32>
    tpu.vector_store %arg12[%c0_55, %c1536], %65 {strides = array<i32>} : memref<2x4096xf32, #tpu.memory_space<vmem>>, vector<1x256xf32>,
    %67 = vector.extract_strided_slice %52 {offsets = [7, 0], sizes = [1, 256], strides = [1, 1]} : vector<16x512xf32> to vector<1x256xf32>
    %c0_56 = arith.constant 0 : index
    %c1792 = arith.constant 1792 : index
    %68 = vector.load %arg12[%c0_56, %c1792] : memref<2x4096xf32, #tpu.memory_space<vmem>>, vector<1x256xf32>
    tpu.vector_store %arg12[%c0_56, %c1792], %67 {strides = array<i32>} : memref<2x4096xf32, #tpu.memory_space<vmem>>, vector<1x256xf32>,
    %69 = vector.extract_strided_slice %52 {offsets = [8, 0], sizes = [1, 256], strides = [1, 1]} : vector<16x512xf32> to vector<1x256xf32>
    %c0_57 = arith.constant 0 : index
    %c2048 = arith.constant 2048 : index
    %70 = vector.load %arg12[%c0_57, %c2048] : memref<2x4096xf32, #tpu.memory_space<vmem>>, vector<1x256xf32>
    tpu.vector_store %arg12[%c0_57, %c2048], %69 {strides = array<i32>} : memref<2x4096xf32, #tpu.memory_space<vmem>>, vector<1x256xf32>,
    %71 = vector.extract_strided_slice %52 {offsets = [9, 0], sizes = [1, 256], strides = [1, 1]} : vector<16x512xf32> to vector<1x256xf32>
    %c0_58 = arith.constant 0 : index
    %c2304 = arith.constant 2304 : index
    %72 = vector.load %arg12[%c0_58, %c2304] : memref<2x4096xf32, #tpu.memory_space<vmem>>, vector<1x256xf32>
    tpu.vector_store %arg12[%c0_58, %c2304], %71 {strides = array<i32>} : memref<2x4096xf32, #tpu.memory_space<vmem>>, vector<1x256xf32>,
    %73 = vector.extract_strided_slice %52 {offsets = [10, 0], sizes = [1, 256], strides = [1, 1]} : vector<16x512xf32> to vector<1x256xf32>
    %c0_59 = arith.constant 0 : index
    %c2560 = arith.constant 2560 : index
    %74 = vector.load %arg12[%c0_59, %c2560] : memref<2x4096xf32, #tpu.memory_space<vmem>>, vector<1x256xf32>
    tpu.vector_store %arg12[%c0_59, %c2560], %73 {strides = array<i32>} : memref<2x4096xf32, #tpu.memory_space<vmem>>, vector<1x256xf32>,
    %75 = vector.extract_strided_slice %52 {offsets = [11, 0], sizes = [1, 256], strides = [1, 1]} : vector<16x512xf32> to vector<1x256xf32>
    %c0_60 = arith.constant 0 : index
    %c2816 = arith.constant 2816 : index
    %76 = vector.load %arg12[%c0_60, %c2816] : memref<2x4096xf32, #tpu.memory_space<vmem>>, vector<1x256xf32>
    tpu.vector_store %arg12[%c0_60, %c2816], %75 {strides = array<i32>} : memref<2x4096xf32, #tpu.memory_space<vmem>>, vector<1x256xf32>,
    %77 = vector.extract_strided_slice %52 {offsets = [12, 0], sizes = [1, 256], strides = [1, 1]} : vector<16x512xf32> to vector<1x256xf32>
    %c0_61 = arith.constant 0 : index
    %c3072 = arith.constant 3072 : index
    %78 = vector.load %arg12[%c0_61, %c3072] : memref<2x4096xf32, #tpu.memory_space<vmem>>, vector<1x256xf32>
    tpu.vector_store %arg12[%c0_61, %c3072], %77 {strides = array<i32>} : memref<2x4096xf32, #tpu.memory_space<vmem>>, vector<1x256xf32>,
    %79 = vector.extract_strided_slice %52 {offsets = [13, 0], sizes = [1, 256], strides = [1, 1]} : vector<16x512xf32> to vector<1x256xf32>
    %c0_62 = arith.constant 0 : index
    %c3328 = arith.constant 3328 : index
    %80 = vector.load %arg12[%c0_62, %c3328] : memref<2x4096xf32, #tpu.memory_space<vmem>>, vector<1x256xf32>
    tpu.vector_store %arg12[%c0_62, %c3328], %79 {strides = array<i32>} : memref<2x4096xf32, #tpu.memory_space<vmem>>, vector<1x256xf32>,
    %81 = vector.extract_strided_slice %52 {offsets = [14, 0], sizes = [1, 256], strides = [1, 1]} : vector<16x512xf32> to vector<1x256xf32>
    %c0_63 = arith.constant 0 : index
    %c3584 = arith.constant 3584 : index
    %82 = vector.load %arg12[%c0_63, %c3584] : memref<2x4096xf32, #tpu.memory_space<vmem>>, vector<1x256xf32>
    tpu.vector_store %arg12[%c0_63, %c3584], %81 {strides = array<i32>} : memref<2x4096xf32, #tpu.memory_space<vmem>>, vector<1x256xf32>,
    %83 = vector.extract_strided_slice %52 {offsets = [15, 0], sizes = [1, 256], strides = [1, 1]} : vector<16x512xf32> to vector<1x256xf32>
    %c0_64 = arith.constant 0 : index
    %c3840 = arith.constant 3840 : index
    %84 = vector.load %arg12[%c0_64, %c3840] : memref<2x4096xf32, #tpu.memory_space<vmem>>, vector<1x256xf32>
    tpu.vector_store %arg12[%c0_64, %c3840], %83 {strides = array<i32>} : memref<2x4096xf32, #tpu.memory_space<vmem>>, vector<1x256xf32>,
    %85 = vector.extract_strided_slice %52 {offsets = [0, 256], sizes = [1, 256], strides = [1, 1]} : vector<16x512xf32> to vector<1x256xf32>
    %c1 = arith.constant 1 : index
    %c0_65 = arith.constant 0 : index
    %86 = vector.load %arg12[%c1, %c0_65] : memref<2x4096xf32, #tpu.memory_space<vmem>>, vector<1x256xf32>
    tpu.vector_store %arg12[%c1, %c0_65], %85 {strides = array<i32>} : memref<2x4096xf32, #tpu.memory_space<vmem>>, vector<1x256xf32>,
    %87 = vector.extract_strided_slice %52 {offsets = [1, 256], sizes = [1, 256], strides = [1, 1]} : vector<16x512xf32> to vector<1x256xf32>
    %c1_66 = arith.constant 1 : index
    %c256_67 = arith.constant 256 : index
    %88 = vector.load %arg12[%c1_66, %c256_67] : memref<2x4096xf32, #tpu.memory_space<vmem>>, vector<1x256xf32>
    tpu.vector_store %arg12[%c1_66, %c256_67], %87 {strides = array<i32>} : memref<2x4096xf32, #tpu.memory_space<vmem>>, vector<1x256xf32>,
    %89 = vector.extract_strided_slice %52 {offsets = [2, 256], sizes = [1, 256], strides = [1, 1]} : vector<16x512xf32> to vector<1x256xf32>
    %c1_68 = arith.constant 1 : index
    %c512_69 = arith.constant 512 : index
    %90 = vector.load %arg12[%c1_68, %c512_69] : memref<2x4096xf32, #tpu.memory_space<vmem>>, vector<1x256xf32>
    tpu.vector_store %arg12[%c1_68, %c512_69], %89 {strides = array<i32>} : memref<2x4096xf32, #tpu.memory_space<vmem>>, vector<1x256xf32>,
    %91 = vector.extract_strided_slice %52 {offsets = [3, 256], sizes = [1, 256], strides = [1, 1]} : vector<16x512xf32> to vector<1x256xf32>
    %c1_70 = arith.constant 1 : index
    %c768_71 = arith.constant 768 : index
    %92 = vector.load %arg12[%c1_70, %c768_71] : memref<2x4096xf32, #tpu.memory_space<vmem>>, vector<1x256xf32>
    tpu.vector_store %arg12[%c1_70, %c768_71], %91 {strides = array<i32>} : memref<2x4096xf32, #tpu.memory_space<vmem>>, vector<1x256xf32>,
    %93 = vector.extract_strided_slice %52 {offsets = [4, 256], sizes = [1, 256], strides = [1, 1]} : vector<16x512xf32> to vector<1x256xf32>
    %c1_72 = arith.constant 1 : index
    %c1024_73 = arith.constant 1024 : index
    %94 = vector.load %arg12[%c1_72, %c1024_73] : memref<2x4096xf32, #tpu.memory_space<vmem>>, vector<1x256xf32>
    tpu.vector_store %arg12[%c1_72, %c1024_73], %93 {strides = array<i32>} : memref<2x4096xf32, #tpu.memory_space<vmem>>, vector<1x256xf32>,
    %95 = vector.extract_strided_slice %52 {offsets = [5, 256], sizes = [1, 256], strides = [1, 1]} : vector<16x512xf32> to vector<1x256xf32>
    %c1_74 = arith.constant 1 : index
    %c1280_75 = arith.constant 1280 : index
    %96 = vector.load %arg12[%c1_74, %c1280_75] : memref<2x4096xf32, #tpu.memory_space<vmem>>, vector<1x256xf32>
    tpu.vector_store %arg12[%c1_74, %c1280_75], %95 {strides = array<i32>} : memref<2x4096xf32, #tpu.memory_space<vmem>>, vector<1x256xf32>,
    %97 = vector.extract_strided_slice %52 {offsets = [6, 256], sizes = [1, 256], strides = [1, 1]} : vector<16x512xf32> to vector<1x256xf32>
    %c1_76 = arith.constant 1 : index
    %c1536_77 = arith.constant 1536 : index
    %98 = vector.load %arg12[%c1_76, %c1536_77] : memref<2x4096xf32, #tpu.memory_space<vmem>>, vector<1x256xf32>
    tpu.vector_store %arg12[%c1_76, %c1536_77], %97 {strides = array<i32>} : memref<2x4096xf32, #tpu.memory_space<vmem>>, vector<1x256xf32>,
    %99 = vector.extract_strided_slice %52 {offsets = [7, 256], sizes = [1, 256], strides = [1, 1]} : vector<16x512xf32> to vector<1x256xf32>
    %c1_78 = arith.constant 1 : index
    %c1792_79 = arith.constant 1792 : index
    %100 = vector.load %arg12[%c1_78, %c1792_79] : memref<2x4096xf32, #tpu.memory_space<vmem>>, vector<1x256xf32>
    tpu.vector_store %arg12[%c1_78, %c1792_79], %99 {strides = array<i32>} : memref<2x4096xf32, #tpu.memory_space<vmem>>, vector<1x256xf32>,
    %101 = vector.extract_strided_slice %52 {offsets = [8, 256], sizes = [1, 256], strides = [1, 1]} : vector<16x512xf32> to vector<1x256xf32>
    %c1_80 = arith.constant 1 : index
    %c2048_81 = arith.constant 2048 : index
    %102 = vector.load %arg12[%c1_80, %c2048_81] : memref<2x4096xf32, #tpu.memory_space<vmem>>, vector<1x256xf32>
    tpu.vector_store %arg12[%c1_80, %c2048_81], %101 {strides = array<i32>} : memref<2x4096xf32, #tpu.memory_space<vmem>>, vector<1x256xf32>,
    %103 = vector.extract_strided_slice %52 {offsets = [9, 256], sizes = [1, 256], strides = [1, 1]} : vector<16x512xf32> to vector<1x256xf32>
    %c1_82 = arith.constant 1 : index
    %c2304_83 = arith.constant 2304 : index
    %104 = vector.load %arg12[%c1_82, %c2304_83] : memref<2x4096xf32, #tpu.memory_space<vmem>>, vector<1x256xf32>
    tpu.vector_store %arg12[%c1_82, %c2304_83], %103 {strides = array<i32>} : memref<2x4096xf32, #tpu.memory_space<vmem>>, vector<1x256xf32>,
    %105 = vector.extract_strided_slice %52 {offsets = [10, 256], sizes = [1, 256], strides = [1, 1]} : vector<16x512xf32> to vector<1x256xf32>
    %c1_84 = arith.constant 1 : index
    %c2560_85 = arith.constant 2560 : index
    %106 = vector.load %arg12[%c1_84, %c2560_85] : memref<2x4096xf32, #tpu.memory_space<vmem>>, vector<1x256xf32>
    tpu.vector_store %arg12[%c1_84, %c2560_85], %105 {strides = array<i32>} : memref<2x4096xf32, #tpu.memory_space<vmem>>, vector<1x256xf32>,
    %107 = vector.extract_strided_slice %52 {offsets = [11, 256], sizes = [1, 256], strides = [1, 1]} : vector<16x512xf32> to vector<1x256xf32>
    %c1_86 = arith.constant 1 : index
    %c2816_87 = arith.constant 2816 : index
    %108 = vector.load %arg12[%c1_86, %c2816_87] : memref<2x4096xf32, #tpu.memory_space<vmem>>, vector<1x256xf32>
    tpu.vector_store %arg12[%c1_86, %c2816_87], %107 {strides = array<i32>} : memref<2x4096xf32, #tpu.memory_space<vmem>>, vector<1x256xf32>,
    %109 = vector.extract_strided_slice %52 {offsets = [12, 256], sizes = [1, 256], strides = [1, 1]} : vector<16x512xf32> to vector<1x256xf32>
    %c1_88 = arith.constant 1 : index
    %c3072_89 = arith.constant 3072 : index
    %110 = vector.load %arg12[%c1_88, %c3072_89] : memref<2x4096xf32, #tpu.memory_space<vmem>>, vector<1x256xf32>
    tpu.vector_store %arg12[%c1_88, %c3072_89], %109 {strides = array<i32>} : memref<2x4096xf32, #tpu.memory_space<vmem>>, vector<1x256xf32>,
    %111 = vector.extract_strided_slice %52 {offsets = [13, 256], sizes = [1, 256], strides = [1, 1]} : vector<16x512xf32> to vector<1x256xf32>
    %c1_90 = arith.constant 1 : index
    %c3328_91 = arith.constant 3328 : index
    %112 = vector.load %arg12[%c1_90, %c3328_91] : memref<2x4096xf32, #tpu.memory_space<vmem>>, vector<1x256xf32>
    tpu.vector_store %arg12[%c1_90, %c3328_91], %111 {strides = array<i32>} : memref<2x4096xf32, #tpu.memory_space<vmem>>, vector<1x256xf32>,
    %113 = vector.extract_strided_slice %52 {offsets = [14, 256], sizes = [1, 256], strides = [1, 1]} : vector<16x512xf32> to vector<1x256xf32>
    %c1_92 = arith.constant 1 : index
    %c3584_93 = arith.constant 3584 : index
    %114 = vector.load %arg12[%c1_92, %c3584_93] : memref<2x4096xf32, #tpu.memory_space<vmem>>, vector<1x256xf32>
    tpu.vector_store %arg12[%c1_92, %c3584_93], %113 {strides = array<i32>} : memref<2x4096xf32, #tpu.memory_space<vmem>>, vector<1x256xf32>,
    %115 = vector.extract_strided_slice %52 {offsets = [15, 256], sizes = [1, 256], strides = [1, 1]} : vector<16x512xf32> to vector<1x256xf32>
    %c1_94 = arith.constant 1 : index
    %c3840_95 = arith.constant 3840 : index
    %116 = vector.load %arg12[%c1_94, %c3840_95] : memref<2x4096xf32, #tpu.memory_space<vmem>>, vector<1x256xf32>
    tpu.vector_store %arg12[%c1_94, %c3840_95], %115 {strides = array<i32>} : memref<2x4096xf32, #tpu.memory_space<vmem>>, vector<1x256xf32>,
    %c0_96 = arith.constant 0 : index
    %c0_97 = arith.constant 0 : index
    %117 = vector.load %arg12[%c0_96, %c0_97] : memref<2x4096xf32, #tpu.memory_space<vmem>>, vector<2x4096xf32>
    %118 = arith.truncf %117 : vector<2x4096xf32> to vector<2x4096xbf16>
    %c0_98 = arith.constant 0 : index
    %c0_99 = arith.constant 0 : index
    %119 = vector.load %arg5[%c0_98, %c0_99] : memref<4096x64xbf16, #tpu.memory_space<vmem>>, vector<4096x64xbf16>
    %cst_100 = arith.constant dense<0.000000e+00> : vector<2x64xf32>
    %120 = tpu.matmul %118, %119, %cst_100 {dimension_numbers = #tpu.dot_dimension_numbers<[1], [0], [0], [1], [0, 0, 1, 1], [], []>} : vector<2x4096xbf16>, vector<4096x64xbf16>, vector<2x64xf32> -> vector<2x64xf32>
    %c0_101 = arith.constant 0 : index
    %c0_102 = arith.constant 0 : index
    %121 = vector.load %arg6[%c0_101, %c0_102] : memref<1x64xf32, #tpu.memory_space<vmem>>, vector<1x64xf32>
    %122 = vector.broadcast %121 : vector<1x64xf32> to vector<2x64xf32>
    %123 = arith.addf %120, %122 : vector<2x64xf32>
    %cst_103 = arith.constant 0.000000e+00 : f32
    %124 = vector.broadcast %cst_103 : f32 to vector<2x64xf32>
    %125 = arith.maximumf %123, %124 : vector<2x64xf32>
    %126 = arith.truncf %125 : vector<2x64xf32> to vector<2x64xbf16>
    %c0_104 = arith.constant 0 : index
    %c0_105 = arith.constant 0 : index
    %127 = vector.load %arg7[%c0_104, %c0_105] : memref<64x2xbf16, #tpu.memory_space<vmem>>, vector<64x2xbf16>
    %cst_106 = arith.constant dense<0.000000e+00> : vector<2x2xf32>
    %128 = tpu.matmul %126, %127, %cst_106 {dimension_numbers = #tpu.dot_dimension_numbers<[1], [0], [0], [1], [0, 0, 1, 1], [], []>} : vector<2x64xbf16>, vector<64x2xbf16>, vector<2x2xf32> -> vector<2x2xf32>
    %c0_107 = arith.constant 0 : index
    %c0_108 = arith.constant 0 : index
    %129 = vector.load %arg8[%c0_107, %c0_108] : memref<1x2xf32, #tpu.memory_space<vmem>>, vector<1x2xf32>
    %130 = vector.broadcast %129 : vector<1x2xf32> to vector<2x2xf32>
    %131 = arith.addf %128, %130 : vector<2x2xf32>
    %c0_109 = arith.constant 0 : index
    %c0_110 = arith.constant 0 : index
    %132 = vector.load %arg9[%c0_109, %c0_110] : memref<2x2xf32, #tpu.memory_space<vmem>>, vector<2x2xf32>
    tpu.vector_store %arg9[%c0_109, %c0_110], %131 {strides = array<i32>} : memref<2x2xf32, #tpu.memory_space<vmem>>, vector<2x2xf32>,
    return
  }
}

</mosaic_0001>

<bundles_post_ra>
// kernel: forward.1
= control target key start
LH: loop header
LB: loop body
LE: loop exit
PB: predicated region body
PF: predicated region fallthrough
CT: control target
= control target key end

     0   :  { %s5007_s13 = smov 112   ;;  %s5008_s14 = smov 127   ;;  %v5015_v4 = vmov 0   ;;  %v53_v6 = vlaneseq  ;;  %vm274_vm8 = vcmask 1041408   ;;  %vm270_vm9 = vcmask 293888   ;;  %s6355_s0 = inlined_call_operand.vmem [shape: f32[4,512], index: 0, kind: input, shape index: {}]   ;;  %s6356_s2 = inlined_call_operand.vmem [shape: f32[8,1], index: 2, kind: input, shape index: {}]   ;;  %s6357_s1 = inlined_call_operand.vmem [shape: bf16[8,36], index: 1, kind: input, shape index: {}]   ;;  %s6358_s4 = inlined_call_operand.vmem [shape: f32[16,1], index: 4, kind: input, shape index: {}]   ;;  %s6359_s3 = inlined_call_operand.vmem [shape: bf16[16,72], index: 3, kind: input, shape index: {}]   ;;  %s6360_s5 = inlined_call_operand.vmem [shape: bf16[4096,64], index: 5, kind: input, shape index: {}]   ;;  %s6361_s6 = inlined_call_operand.vmem [shape: f32[1,64], index: 6, kind: input, shape index: {}]   ;;  %s6362_s7 = inlined_call_operand.vmem [shape: bf16[64,2], index: 7, kind: input, shape index: {}]   ;;  %s6363_s8 = inlined_call_operand.vmem [shape: f32[1,2], index: 8, kind: input, shape index: {}]   ;;  %s6364_s9 = inlined_call_operand.vmem [shape: f32[2,2], index: 9, kind: output, shape index: {}]  }
   0x1   :  { %v34_v0 = vld [vmem:[%s6355_s0 + $0x8] sm:$0xff]  ;;  %v33_v1 = vld [vmem:[%s6355_s0] sm:$0xff]  ;;  %s5009_s0 = smov 126   ;;  %s5010_s15 = smov 110   ;;  %319 = vmatprep.mubr.bf16.mxu1 %v5015_v4  ;;  %4654 = vset.pattern.permute.xlu0 %v5015_v4  ;;  %vm584_vm10 = vcmask 1043456   ;;  %vm580_vm11 = vcmask 588800  }
   0x2   :  { %97 = vrot.lane.b32.xlu1 %v34_v0, %s5007_s13  ;;  %41 = vst [vmem:[#allocation2] sm:$0xf] %v33_v1  ;;  %43 = vst [vmem:[#allocation2 + $0x10] sm:$0xf] %v34_v0  ;;  %49 = vrot.lane.b32.xlu0 %v34_v0, %s5008_s14  ;;  %v37_v2 = vcombine.high %v33_v1, %v33_v1  ;;  %v38_v3 = vcombine.high %v34_v0, %v34_v0  ;;  %s5011_s16 = smov 95   ;;  %s5012_s17 = smov 111  }
   0x3   :  { %s5013_s18 = smov 96   ;;  %s5014_s19 = smov 94   ;;  %629 = vmatprep.mubr.bf16.mxu0 %v5015_v4  ;;  %4735 = vset.pattern.permute.xlu1 %v5015_v4  ;;  %v264_v5 = vld [vmem:[%s6356_s2] sm:$0xff]  ;;  %v5116_v7 = vand.u32 127, %v53_v6  ;;  %vm5474_vm12 = vcmp.lt.s32.totalorder %v53_v6, 256  ;;  %vm5019_vm13 = vmmov 0  }
   0x4   :  { %42 = vst [vmem:[#allocation2 + $0x8] sm:$0xf] %v37_v2  ;;  %44 = vst [vmem:[#allocation2 + $0x18] sm:$0xf] %v38_v3  ;;  %vm3950_vm14 = vcmask 523264   ;;  %vm3994_vm15 = vcmask 9216  }
   0x5   :  { %vm101_vm0 = vcmp.lt.s32.totalorder %v5116_v7, 112  ;;  %vm55_vm1 = vcmp.lt.s32.totalorder %v5116_v7, 127  ;;  %vm84_vm2 = vcmp.lt.s32.totalorder %v5116_v7, 126  ;;  %vm147_vm3 = vcmp.lt.s32.totalorder %v5116_v7, 110 }
   0x6   :  { %95 = vrot.lane.b32.xlu1 %v37_v2, %s5007_s13  ;;  %47 = vrot.lane.b32.xlu0 %v37_v2, %s5008_s14  ;;  %vm193_vm4 = vcmp.lt.s32.totalorder %v5116_v7, 95  ;;  %vm130_vm5 = vcmp.lt.s32.totalorder %v5116_v7, 111  ;;  %vm176_vm6 = vcmp.lt.s32.totalorder %v5116_v7, 96  ;;  %vm222_vm7 = vcmp.lt.s32.totalorder %v5116_v7, 94 }
   0xa   :  { %93 = vrot.lane.b32.xlu1 %v33_v1, %s5007_s13  ;;  %45 = vrot.lane.b32.xlu0 %v33_v1, %s5008_s14 }
   0xe   :  { %80 = vrot.lane.b32.xlu1 %v34_v0, %s5009_s0  ;;  %78 = vrot.lane.b32.xlu0 %v37_v2, %s5009_s0 }
  0x12   :  { %141 = vrot.lane.b32.xlu1 %v37_v2, %s5010_s15  ;;  %76 = vrot.lane.b32.xlu0 %v33_v1, %s5009_s0 }
  0x16   :  { %187 = vrot.lane.b32.xlu1 %v37_v2, %s5011_s16  ;;  %143 = vrot.lane.b32.xlu0 %v34_v0, %s5010_s15 }
  0x1a   :  { %139 = vrot.lane.b32.xlu1 %v33_v1, %s5010_s15  ;;  %189 = vrot.lane.b32.xlu0 %v34_v0, %s5011_s16 }
  0x1e   :  { %124 = vrot.lane.b32.xlu1 %v37_v2, %s5012_s17  ;;  %185 = vrot.lane.b32.xlu0 %v33_v1, %s5011_s16 }
  0x22   :  { %170 = vrot.lane.b32.xlu1 %v37_v2, %s5013_s18  ;;  %126 = vrot.lane.b32.xlu0 %v34_v0, %s5012_s17 }
  0x26   :  { %122 = vrot.lane.b32.xlu1 %v33_v1, %s5012_s17  ;;  %172 = vrot.lane.b32.xlu0 %v34_v0, %s5013_s18 }
  0x2a   :  { %214 = vrot.lane.b32.xlu1 %v33_v1, %s5014_s19  ;;  %168 = vrot.lane.b32.xlu0 %v33_v1, %s5013_s18 }
  0x2e   :  { %218 = vrot.lane.b32.xlu1 %v34_v0, %s5014_s19  ;;  %216 = vrot.lane.b32.xlu0 %v37_v2, %s5014_s19 }
  0x32   :  { %99 = vrot.lane.b32.xlu1 %v38_v3, %s5007_s13  ;;  %51 = vrot.lane.b32.xlu0 %v38_v3, %s5008_s14 }
  0x36   :  { %145 = vrot.lane.b32.xlu1 %v38_v3, %s5010_s15  ;;  %82 = vrot.lane.b32.xlu0 %v38_v3, %s5009_s0 }
  0x3a   :  { %128 = vrot.lane.b32.xlu1 %v38_v3, %s5012_s17  ;;  %191 = vrot.lane.b32.xlu0 %v38_v3, %s5011_s16 }
  0x3e   :  { %220 = vrot.lane.b32.xlu1 %v38_v3, %s5014_s19  ;;  %174 = vrot.lane.b32.xlu0 %v38_v3, %s5013_s18 }
  0x42   :  { %267 = vperm.xlu0 %4654, %v264_v5  }
  0x74   :  { %v5118_v8 = vpop.permute.xlu1 %97  ;;  %v5120_v9 = vpop.permute.xlu0 %49 }
  0x78   :  { %v96_v10 = vpop.permute.xlu1 %95  ;;  %v48_v11 = vpop.permute.xlu0 %47 }
  0x79   :  { %v103_v12 = vsel %vm101_vm0, %v96_v10, %v5118_v8  ;;  %v57_v13 = vsel %vm55_vm1, %v48_v11, %v5120_v9 }
  0x7a   :  { %v111_v14 = vrot.slane %v103_v12, 4  ;;  %v65_v15 = vrot.slane %v57_v13, 4 }
  0x7c   :  { %119 = vst [vmem:[#allocation2 + $0x28] sm:$0xf0] %v111_v14  ;;  %73 = vst [vmem:[#allocation2 + $0x8] sm:$0xf0] %v65_v15  ;;  %v5130_v16 = vpop.permute.xlu1 %93  ;;  %v5132_v17 = vpop.permute.xlu0 %45 }
  0x7d   :  { %v104_v18 = vsel %vm101_vm0, %v5130_v16, %v96_v10  ;;  %v58_v19 = vsel %vm55_vm1, %v5132_v17, %v48_v11 }
  0x7e   :  { %v110_v20 = vrot.slane %v104_v18, 4  ;;  %v64_v21 = vrot.slane %v58_v19, 4 }
  0x80   :  { %118 = vst [vmem:[#allocation2 + $0x20] sm:$0xf0] %v110_v20  ;;  %72 = vst [vmem:[#allocation2] sm:$0xf0] %v64_v21  ;;  %v5141_v22 = vpop.permute.xlu1 %80  ;;  %v79_v23 = vpop.permute.xlu0 %78 }
  0x81   :  { %v86_v24 = vsel %vm84_vm2, %v79_v23, %v5141_v22 }
  0x82   :  { %90 = vst [vmem:[#allocation2 + $0x28] sm:$0xf] %v86_v24 }
  0x83   :  { %v233_v31 = vld [vmem:[#allocation2 + $0x8] sm:$0xff] }
  0x84   :  { %v142_v25 = vpop.permute.xlu1 %141  ;;  %v5146_v26 = vpop.permute.xlu0 %76 }
  0x85   :  { %v87_v27 = vsel %vm84_vm2, %v5146_v26, %v79_v23 }
  0x86   :  { %89 = vst [vmem:[#allocation2 + $0x20] sm:$0xf] %v87_v27 }
  0x87   :  { %v232_v39 = vld [vmem:[#allocation2] sm:$0xff] }
  0x88   :  { %v188_v28 = vpop.permute.xlu1 %187  ;;  %v5152_v29 = vpop.permute.xlu0 %143 }
  0x89   :  { %v149_v30 = vsel %vm147_vm3, %v142_v25, %v5152_v29  ;;  %v237_v32 = vld [vmem:[#allocation2 + $0x28] sm:$0xff] }
  0x8a   :  { %v157_v33 = vrot.slane %v149_v30, 4  ;;  %v253_v34 = vpack.c.bf16 %v237_v32, %v233_v31 }
  0x8c   :  { %165 = vst [vmem:[#allocation2 + $0x48] sm:$0xf0] %v157_v33  ;;  %v5158_v35 = vpop.permute.xlu1 %139  ;;  %v5160_v36 = vpop.permute.xlu0 %189  ;;  %287 = vmatprep.subr.bf16.mxu1 %v253_v34 }
  0x8d   :  { %v150_v37 = vsel %vm147_vm3, %v5158_v35, %v142_v25  ;;  %v195_v38 = vsel %vm193_vm4, %v188_v28, %v5160_v36  ;;  %v236_v40 = vld [vmem:[#allocation2 + $0x20] sm:$0xff] }
  0x8e   :  { %v156_v41 = vrot.slane %v150_v37, 4  ;;  %v203_v42 = vrot.slane %v195_v38, 4  ;;  %v252_v43 = vpack.c.bf16 %v236_v40, %v232_v39  ;;  %v231_v37 = vld [vmem:[%s6357_s1] sm:$0xf] }
  0x90   :  { %164 = vst [vmem:[#allocation2 + $0x40] sm:$0xf0] %v156_v41  ;;  %211 = vst [vmem:[#allocation2 + $0x68] sm:$0xf0] %v203_v42  ;;  %v125_v44 = vpop.permute.xlu1 %124  ;;  %v5168_v45 = vpop.permute.xlu0 %185  ;;  %288 = vmatpush1.bf16.msra.mxu1 %v252_v43 }
  0x91   :  { %v196_v46 = vsel %vm193_vm4, %v5168_v45, %v188_v28 }
  0x92   :  { %v202_v47 = vrot.slane %v196_v46, 4 }
  0x94   :  { %210 = vst [vmem:[#allocation2 + $0x60] sm:$0xf0] %v202_v47  ;;  %v171_v48 = vpop.permute.xlu1 %170  ;;  %v5174_v49 = vpop.permute.xlu0 %126 }
  0x95   :  { %v132_v50 = vsel %vm130_vm5, %v125_v44, %v5174_v49 }
  0x96   :  { %136 = vst [vmem:[#allocation2 + $0x48] sm:$0xf] %v132_v50 }
  0x98   :  { %v5180_v51 = vpop.permute.xlu1 %122  ;;  %v5182_v52 = vpop.permute.xlu0 %172 }
  0x99   :  { %v133_v53 = vsel %vm130_vm5, %v5180_v51, %v125_v44  ;;  %v178_v54 = vsel %vm176_vm6, %v171_v48, %v5182_v52 }
  0x9a   :  { %135 = vst [vmem:[#allocation2 + $0x40] sm:$0xf] %v133_v53  ;;  %182 = vst [vmem:[#allocation2 + $0x68] sm:$0xf] %v178_v54 }
  0x9c   :  { %v5190_v55 = vpop.permute.xlu1 %214  ;;  %v5192_v56 = vpop.permute.xlu0 %168 }
  0x9d   :  { %v179_v57 = vsel %vm176_vm6, %v5192_v56, %v171_v48  ;;  %v241_v62 = vld [vmem:[#allocation2 + $0x48] sm:$0xff] }
  0x9e   :  { %181 = vst [vmem:[#allocation2 + $0x60] sm:$0xf] %v179_v57 }
  0xa0   :  { %v5198_v58 = vpop.permute.xlu1 %218  ;;  %v217_v59 = vpop.permute.xlu0 %216 }
  0xa1   :  { %v224_v60 = vsel %vm222_vm7, %v217_v59, %v5198_v58  ;;  %v225_v61 = vsel %vm222_vm7, %v5190_v55, %v217_v59  ;;  %v245_v63 = vld [vmem:[#allocation2 + $0x68] sm:$0xff]  ;;  %v240_v19 = vld [vmem:[#allocation2 + $0x40] sm:$0xff] }
  0xa2   :  { %227 = vst [vmem:[#allocation2 + $0x80] sm:$0xf] %v225_v61  ;;  %228 = vst [vmem:[#allocation2 + $0x88] sm:$0xf] %v224_v60  ;;  %v257_v0 = vpack.c.bf16 %v245_v63, %v241_v62 }
  0xa4   :  { %v100_v1 = vpop.permute.xlu1 %99  ;;  %v52_v2 = vpop.permute.xlu0 %51  ;;  %289 = vmatprep.subr.bf16.mxu1 %v257_v0 }
  0xa5   :  { %v102_v3 = vsel %vm101_vm0, %v5118_v8, %v100_v1  ;;  %v105_v5 = vsel %vm101_vm0, %v100_v1, %v5130_v16  ;;  %v56_v10 = vsel %vm55_vm1, %v5120_v9, %v52_v2  ;;  %v59_v11 = vsel %vm55_vm1, %v52_v2, %v5132_v17  ;;  %v244_v12 = vld [vmem:[#allocation2 + $0x60] sm:$0xff] }
  0xa6   :  { %v112_v13 = vrot.slane %v102_v3, 4  ;;  %v113_v14 = vrot.slane %v105_v5, 4  ;;  %v66_v15 = vrot.slane %v56_v10, 4  ;;  %v67_v18 = vrot.slane %v59_v11, 4 }
  0xa7   :  { %v256_v20 = vpack.c.bf16 %v244_v12, %v240_v19 }
  0xa8   :  { %120 = vst [vmem:[#allocation2 + $0x30] sm:$0xf0] %v112_v13  ;;  %121 = vst [vmem:[#allocation2 + $0x38] sm:$0xf0] %v113_v14  ;;  %v146_v8 = vpop.permute.xlu1 %145  ;;  %v83_v16 = vpop.permute.xlu0 %82 }
  0xa9   :  { %74 = vst [vmem:[#allocation2 + $0x10] sm:$0xf0] %v66_v15  ;;  %75 = vst [vmem:[#allocation2 + $0x18] sm:$0xf0] %v67_v18  ;;  %v148_v9 = vsel %vm147_vm3, %v5152_v29, %v146_v8  ;;  %v151_v17 = vsel %vm147_vm3, %v146_v8, %v5158_v35  ;;  %v85_v21 = vsel %vm84_vm2, %v5141_v22, %v83_v16  ;;  %290 = vmatpush1.bf16.msra.mxu1 %v256_v20  ;;  %v249_v24 = vld [vmem:[#allocation2 + $0x88] sm:$0xf] }
  0xaa   :  { %v88_v23 = vsel %vm84_vm2, %v83_v16, %v5146_v26  ;;  %v248_v25 = vld [vmem:[#allocation2 + $0x80] sm:$0xf]  ;;  %v158_v27 = vrot.slane %v148_v9, 4  ;;  %v159_v28 = vrot.slane %v151_v17, 4  ;;  %91 = vst [vmem:[#allocation2 + $0x30] sm:$0xf] %v85_v21  ;;  %v261_v29 = vpack.c.bf16 %v249_v24, %v249_v24 }
  0xab   :  { %92 = vst [vmem:[#allocation2 + $0x38] sm:$0xf] %v88_v23  ;;  %v260_v30 = vpack.c.bf16 %v248_v25, %v248_v25  ;;  %v563_v9 = vld [vmem:[%s6358_s4] sm:$0xff]  ;;  %v564_v17 = vld [vmem:[%s6358_s4 + $0x8] sm:$0xff] }
  0xac   :  { %166 = vst [vmem:[#allocation2 + $0x50] sm:$0xf0] %v158_v27  ;;  %167 = vst [vmem:[#allocation2 + $0x58] sm:$0xf0] %v159_v28  ;;  %v129_v31 = vpop.permute.xlu1 %128  ;;  %v192_v32 = vpop.permute.xlu0 %191  ;;  %4000 = vmatprep.subr.msk.bf16.mxu1 %vm274_vm8, %v261_v29 }
  0xad   :  { %v276_v22 = vsel %vm274_vm8, %v260_v30, 0  ;;  %v131_v26 = vsel %vm130_vm5, %v5174_v49, %v129_v31  ;;  %v134_v33 = vsel %vm130_vm5, %v129_v31, %v5180_v51  ;;  %v194_v34 = vsel %vm193_vm4, %v5160_v36, %v192_v32 }
  0xae   :  { %v197_v35 = vsel %vm193_vm4, %v192_v32, %v5168_v45  ;;  %292 = vmatpush1.bf16.msra.mxu1 %v276_v22  ;;  %137 = vst [vmem:[#allocation2 + $0x50] sm:$0xf] %v131_v26  ;;  %138 = vst [vmem:[#allocation2 + $0x58] sm:$0xf] %v134_v33  ;;  %v204_v38 = vrot.slane %v194_v34, 4 }
  0xaf   :  { %v205_v39 = vrot.slane %v197_v35, 4 }
  0xb0   :  { %212 = vst [vmem:[#allocation2 + $0x70] sm:$0xf0] %v204_v38  ;;  %v221_v40 = vpop.permute.xlu1 %220  ;;  %v175_v41 = vpop.permute.xlu0 %174  ;;  %v235_v36 = vld [vmem:[#allocation2 + $0x18] sm:$0xff]  ;;  %v234_v47 = vld [vmem:[#allocation2 + $0x10] sm:$0xff] }
  0xb1   :  { %213 = vst [vmem:[#allocation2 + $0x78] sm:$0xf0] %v205_v39  ;;  %4001 = vmatmul.mubr.msk.bf16.vlgmr.msra.gmra.mrb[0].mxu1 %vm270_vm9, %v231_v37  ;;  %v223_v42 = vsel %vm222_vm7, %v5198_v58, %v221_v40  ;;  %v226_v43 = vsel %vm222_vm7, %v221_v40, %v5190_v55  ;;  %v177_v44 = vsel %vm176_vm6, %v5182_v52, %v175_v41  ;;  %v238_v48 = vld [vmem:[#allocation2 + $0x30] sm:$0xff] }
  0xb2   :  { %v180_v45 = vsel %vm176_vm6, %v175_v41, %v5192_v56  ;;  %v239_v46 = vld [vmem:[#allocation2 + $0x38] sm:$0xff]  ;;  %360 = vmatprep.mubr.bf16.mxu1 %v5015_v4  ;;  %229 = vst [vmem:[#allocation2 + $0x90] sm:$0xf] %v223_v42  ;;  %230 = vst [vmem:[#allocation2 + $0x98] sm:$0xf] %v226_v43  ;;  %v254_v50 = vpack.c.bf16 %v238_v48, %v234_v47 }
  0xb3   :  { %183 = vst [vmem:[#allocation2 + $0x70] sm:$0xf] %v177_v44  ;;  %184 = vst [vmem:[#allocation2 + $0x78] sm:$0xf] %v180_v45  ;;  %v255_v49 = vpack.c.bf16 %v239_v46, %v235_v36 }
  0xb5   :  { %328 = vmatprep.subr.bf16.mxu1 %v255_v49  ;;  %v243_v51 = vld [vmem:[#allocation2 + $0x58] sm:$0xff]  ;;  %v242_v53 = vld [vmem:[#allocation2 + $0x50] sm:$0xff] }
  0xb6   :  { %329 = vmatpush1.bf16.msra.mxu1 %v254_v50 }
  0xb9   :  { %v251_v55 = vld [vmem:[#allocation2 + $0x98] sm:$0xf]  ;;  %v250_v58 = vld [vmem:[#allocation2 + $0x90] sm:$0xf] }
  0xba   :  { %v247_v52 = vld [vmem:[#allocation2 + $0x78] sm:$0xff]  ;;  %v246_v54 = vld [vmem:[#allocation2 + $0x70] sm:$0xff]  ;;  %v263_v59 = vpack.c.bf16 %v251_v55, %v251_v55  ;;  %v262_v60 = vpack.c.bf16 %v250_v58, %v250_v58 }
  0xbb   :  { %v259_v57 = vpack.c.bf16 %v247_v52, %v243_v51  ;;  %v258_v56 = vpack.c.bf16 %v246_v54, %v242_v53 }
  0xbc   :  { %v282_v61 = vsel %vm274_vm8, %v262_v60, 0 }
  0xbd   :  { %330 = vmatprep.subr.bf16.mxu1 %v259_v57 }
  0xbe   :  { %331 = vmatpush1.bf16.msra.mxu1 %v258_v56 }
  0xbf   :  { %4002 = vmatprep.subr.msk.bf16.mxu1 %vm274_vm8, %v263_v59 }
  0xc1   :  { %v268_v62 = vpop.permute.xlu0 %267 }
  0xc2   :  { %333 = vmatpush1.bf16.msra.mxu1 %v282_v61 }
  0xc5   :  { %4003 = vmatmul.mubr.msk.bf16.vlgmr.msra.gmra.mrb[4].mxu1 %vm270_vm9, %v231_v37 }
  0xc6   :  { %672 = vmatprep.mubr.bf16.mxu1 %v5015_v4 }
 0x184   :  { %v321_v63 = vpop.f32.mrb[0].mxu1 }
 0x185   :  { %v322_v0 = vadd.f32 %v321_v63, %v268_v62  ;;  %v323_v1 = vpop.f32.mrb[1].mxu1 }
 0x186   :  { %v324_v2 = vadd.f32 %v323_v1, %v268_v62  ;;  %v325_v3 = vpop.f32.mrb[2].mxu1 }
 0x187   :  { %v369_v5 = vmax.f32 %v322_v0, 0.0  ;;  %v326_v10 = vpop.f32.mrb[3].mxu1 }
 0x188   :  { %v370_v11 = vmax.f32 %v324_v2, 0.0 }
 0x18a   :  { %v4660_v12 = vpack.i.bf16 %v370_v11, %v369_v5 }
 0x18c   :  { %4661 = vrot.lane.b32.xlu0 %v4660_v12, %s5009_s0  ;;  %4656 = vrot.lane.b32.xlu1 %v4660_v12, %s5008_s14 }
 0x190   :  { %4666 = vrot.lane.b32.xlu0 %v4660_v12, %s5007_s13 }
 0x194   :  { %4671 = vrot.lane.b32.xlu0 %v4660_v12, %s5012_s17 }
 0x198   :  { %v362_v13 = vpop.f32.mrb[4].mxu1  ;;  %4676 = vrot.lane.b32.xlu0 %v4660_v12, %s5010_s15 }
 0x199   :  { %v363_v4 = vadd.f32 %v362_v13, %v268_v62  ;;  %v364_v14 = vpop.f32.mrb[5].mxu1 }
 0x19a   :  { %v365_v15 = vadd.f32 %v364_v14, %v268_v62  ;;  %v366_v18 = vpop.f32.mrb[6].mxu1 }
 0x19b   :  { %v371_v19 = vmax.f32 %v363_v4, 0.0  ;;  %v367_v20 = vpop.f32.mrb[7].mxu1 }
 0x19c   :  { %v372_v8 = vmax.f32 %v365_v15, 0.0  ;;  %4681 = vrot.lane.b32.xlu0 %v4660_v12, %s5013_s18 }
 0x19e   :  { %v4695_v16 = vpack.i.bf16 %v372_v8, %v371_v19 }
 0x1a0   :  { %4686 = vrot.lane.b32.xlu0 %v4660_v12, %s5011_s16  ;;  %4696 = vrot.lane.b32.xlu1 %v4695_v16, %s5008_s14 }
 0x1a4   :  { %4691 = vrot.lane.b32.xlu0 %v4660_v12, %s5014_s19  ;;  %4701 = vrot.lane.b32.xlu1 %v4695_v16, %s5009_s0 }
 0x1a8   :  { %567 = vperm.xlu0 %4654, %v563_v9   ;;  %4706 = vrot.lane.b32.xlu1 %v4695_v16, %s5007_s13 }
 0x1ac   :  { %4711 = vrot.lane.b32.xlu1 %v4695_v16, %s5012_s17 }
 0x1b0   :  { %4716 = vrot.lane.b32.xlu1 %v4695_v16, %s5010_s15 }
 0x1b4   :  { %4721 = vrot.lane.b32.xlu1 %v4695_v16, %s5013_s18 }
 0x1b8   :  { %4726 = vrot.lane.b32.xlu1 %v4695_v16, %s5011_s16 }
 0x1bc   :  { %4731 = vrot.lane.b32.xlu1 %v4695_v16, %s5014_s19 }
 0x1c0   :  { %572 = vperm.xlu1 %4735, %v564_v17  }
 0x1fe   :  { %v4662_v21 = vpop.permute.xlu0 %4661  ;;  %v4657_v24 = vpop.permute.xlu1 %4656 }
 0x1ff   :  { %v4659_v27 = vunpack.i.h.bf16 %v4657_v24  ;;  %v4658_v28 = vunpack.i.l.bf16 %v4657_v24  ;;  %v4664_v40 = vunpack.i.h.bf16 %v4662_v21  ;;  %v4663_v41 = vunpack.i.l.bf16 %v4662_v21 }
 0x201   :  { %v387_v22 = vsel %vm55_vm1, %v4658_v28, %v4659_v27  ;;  %v403_v53 = vsel %vm84_vm2, %v4663_v41, %v4664_v40 }
 0x202   :  { %v4667_v23 = vpop.permute.xlu0 %4666  ;;  %v543_v36 = vpack.c.bf16 %v387_v22, %v369_v5 }
 0x203   :  { %v4669_v42 = vunpack.i.h.bf16 %v4667_v23  ;;  %v4668_v43 = vunpack.i.l.bf16 %v4667_v23 }
 0x205   :  { %v419_v52 = vsel %vm101_vm0, %v4668_v43, %v4669_v42 }
 0x206   :  { %v5287_v25 = vpop.permute.xlu0 %4671  ;;  %v547_v63 = vpack.c.bf16 %v419_v52, %v403_v53  ;;  %v4739_v52 = vld [vmem:[%s6360_s5 + $0x40] sm:$0xff]  }
 0x207   :  { %v4674_v5 = vunpack.i.h.bf16 %v5287_v25  ;;  %v4673_v10 = vunpack.i.l.bf16 %v5287_v25 }
 0x209   :  { %v435_v24 = vsel %vm130_vm5, %v4673_v10, %v4674_v5 }
 0x20a   :  { %v4677_v30 = vpop.permute.xlu0 %4676 }
 0x20b   :  { %v4679_v0 = vunpack.i.h.bf16 %v4677_v30  ;;  %v4678_v1 = vunpack.i.l.bf16 %v4677_v30 }
 0x20d   :  { %v451_v15 = vsel %vm147_vm3, %v4678_v1, %v4679_v0 }
 0x20e   :  { %v5297_v46 = vpop.permute.xlu0 %4681 }
 0x20f   :  { %v4684_v22 = vunpack.i.h.bf16 %v5297_v46 }
 0x212   :  { %v4697_v29 = vpop.permute.xlu1 %4696  ;;  %v4687_v62 = vpop.permute.xlu0 %4686 }
 0x213   :  { %v4699_v31 = vunpack.i.h.bf16 %v4697_v29  ;;  %v4698_v32 = vunpack.i.l.bf16 %v4697_v29  ;;  %v4689_v25 = vunpack.i.h.bf16 %v4687_v62 }
 0x215   :  { %v385_v26 = vsel %vm55_vm1, %v4698_v32, %v4699_v31  ;;  %v386_v33 = vsel %vm55_vm1, %v4659_v27, %v4698_v32  ;;  %v388_v34 = vsel %vm55_vm1, %v4699_v31, %v4658_v28  ;;  %v4688_v27 = vunpack.i.l.bf16 %v4687_v62  ;;  %v4740_v62 = vld [vmem:[%s6360_s5] sm:$0xff]  }
 0x216   :  { %v545_v35 = vpack.c.bf16 %v385_v26, %v371_v19  ;;  %v4702_v37 = vpop.permute.xlu1 %4701  ;;  %v544_v38 = vpack.c.bf16 %v386_v33, %v370_v11  ;;  %v546_v39 = vpack.c.bf16 %v388_v34, %v372_v8  ;;  %v4692_v18 = vpop.permute.xlu0 %4691  ;;  %v551_v28 = vpack.c.bf16 %v451_v15, %v435_v24  ;;  %v4753_v15 = vld [vmem:[%s6360_s5 + $0xd8] sm:$0xff]   ;;  %v4763_v24 = vld [vmem:[%s6360_s5 + $0x70] sm:$0xff]  }
 0x217   :  { %v4704_v44 = vunpack.i.h.bf16 %v4702_v37  ;;  %v4703_v45 = vunpack.i.l.bf16 %v4702_v37  ;;  %v4694_v29 = vunpack.i.h.bf16 %v4692_v18  ;;  %v4693_v30 = vunpack.i.l.bf16 %v4692_v18  ;;  %v4754_v18 = vld [vmem:[%s6360_s5 + $0x98] sm:$0xff]  }
 0x218   :  { %597 = vmatprep.subr.bf16.mxu0 %v544_v38  ;;  %640 = vmatprep.subr.bf16.mxu1 %v546_v39  ;;  %v4683_v26 = vunpack.i.l.bf16 %v5297_v46  ;;  %v483_v39 = vsel %vm193_vm4, %v4688_v27, %v4689_v25 }
 0x219   :  { %598 = vmatpush1.bf16.msra.mxu0 %v543_v36  ;;  %641 = vmatpush1.bf16.msra.mxu1 %v545_v35  ;;  %v401_v50 = vsel %vm84_vm2, %v4703_v45, %v4704_v44  ;;  %v402_v51 = vsel %vm84_vm2, %v4664_v40, %v4703_v45  ;;  %v404_v57 = vsel %vm84_vm2, %v4704_v44, %v4663_v41 }
 0x21a   :  { %v4707_v47 = vpop.permute.xlu1 %4706  ;;  %v499_v40 = vsel %vm222_vm7, %v4693_v30, %v4694_v29 }
 0x21b   :  { %v4709_v48 = vunpack.i.h.bf16 %v4707_v47  ;;  %v4708_v49 = vunpack.i.l.bf16 %v4707_v47  ;;  %v559_v53 = vpack.c.bf16 %v499_v40, %v499_v40 }
 0x21d   :  { %v417_v54 = vsel %vm101_vm0, %v4708_v49, %v4709_v48  ;;  %v418_v55 = vsel %vm101_vm0, %v4669_v42, %v4708_v49  ;;  %v420_v56 = vsel %vm101_vm0, %v4709_v48, %v4668_v43  ;;  %v467_v48 = vsel %vm176_vm6, %v4683_v26, %v4684_v22 }
 0x21e   :  { %v549_v58 = vpack.c.bf16 %v417_v54, %v401_v50  ;;  %v4712_v59 = vpop.permute.xlu1 %4711  ;;  %v548_v60 = vpack.c.bf16 %v418_v55, %v402_v51  ;;  %v550_v61 = vpack.c.bf16 %v420_v56, %v404_v57  ;;  %v555_v51 = vpack.c.bf16 %v483_v39, %v467_v48  ;;  %v4741_v54 = vld [vmem:[%s6360_s5 + $0xc0] sm:$0xff]  }
 0x21f   :  { %v4714_v2 = vunpack.i.h.bf16 %v4712_v59  ;;  %v4713_v3 = vunpack.i.l.bf16 %v4712_v59  ;;  %v586_v7 = vsel %vm584_vm10, %v559_v53, 0 }
 0x220   :  { %599 = vmatprep.subr.bf16.mxu0 %v548_v60  ;;  %642 = vmatprep.subr.bf16.mxu1 %v550_v61  ;;  %v4738_v61 = vld [vmem:[%s6359_s3] sm:$0xff]  }
 0x221   :  { %600 = vmatpush1.bf16.msra.mxu0 %v547_v63  ;;  %643 = vmatpush1.bf16.msra.mxu1 %v549_v58  ;;  %v433_v4 = vsel %vm130_vm5, %v4713_v3, %v4714_v2  ;;  %v434_v14 = vsel %vm130_vm5, %v4674_v5, %v4713_v3  ;;  %v436_v8 = vsel %vm130_vm5, %v4714_v2, %v4673_v10  ;;  %v4742_v63 = vld [vmem:[%s6360_s5 + $0x80] sm:$0xff]   ;;  %v4744_v2 = vld [vmem:[%s6360_s5 + $0x8] sm:$0xff]   ;;  %v4747_v10 = vld [vmem:[%s6360_s5 + $0x50] sm:$0xff]  }
 0x222   :  { %v4717_v11 = vpop.permute.xlu1 %4716  ;;  %v4745_v3 = vld [vmem:[%s6360_s5 + $0xc8] sm:$0xff]  }
 0x223   :  { %v4719_v12 = vunpack.i.h.bf16 %v4717_v11  ;;  %v4718_v13 = vunpack.i.l.bf16 %v4717_v11  ;;  %v4746_v5 = vld [vmem:[%s6360_s5 + $0x88] sm:$0xff]   ;;  %v4748_v11 = vld [vmem:[%s6360_s5 + $0x10] sm:$0xff]  }
 0x225   :  { %v449_v19 = vsel %vm147_vm3, %v4718_v13, %v4719_v12  ;;  %v450_v20 = vsel %vm147_vm3, %v4679_v0, %v4718_v13  ;;  %v452_v16 = vsel %vm147_vm3, %v4719_v12, %v4678_v1  ;;  %v4743_v1 = vld [vmem:[%s6360_s5 + $0x48] sm:$0xff]   ;;  %v4749_v12 = vld [vmem:[%s6360_s5 + $0xd0] sm:$0xff]  }
 0x226   :  { %v553_v9 = vpack.c.bf16 %v449_v19, %v433_v4  ;;  %v4722_v17 = vpop.permute.xlu1 %4721  ;;  %v552_v21 = vpack.c.bf16 %v450_v20, %v434_v14  ;;  %v554_v23 = vpack.c.bf16 %v452_v16, %v436_v8  ;;  %v4750_v13 = vld [vmem:[%s6360_s5 + $0x90] sm:$0xff]   ;;  %v4751_v4 = vld [vmem:[%s6360_s5 + $0x58] sm:$0xff]   ;;  %v4755_v19 = vld [vmem:[%s6360_s5 + $0x60] sm:$0xff]  }
 0x227   :  { %v4724_v31 = vunpack.i.h.bf16 %v4722_v17  ;;  %v4723_v32 = vunpack.i.l.bf16 %v4722_v17  ;;  %v4752_v14 = vld [vmem:[%s6360_s5 + $0x18] sm:$0xff]   ;;  %v4756_v20 = vld [vmem:[%s6360_s5 + $0x20] sm:$0xff]   ;;  %v4760_v17 = vld [vmem:[%s6360_s5 + $0x28] sm:$0xff]   ;;  %v568_v40 = vpop.permute.xlu0 %567 }
 0x228   :  { %601 = vmatprep.subr.bf16.mxu0 %v552_v21  ;;  %644 = vmatprep.subr.bf16.mxu1 %v554_v23  ;;  %v4757_v8 = vld [vmem:[%s6360_s5 + $0xe0] sm:$0xff]   ;;  %v4761_v21 = vld [vmem:[%s6360_s5 + $0xe8] sm:$0xff]  }
 0x229   :  { %602 = vmatpush1.bf16.msra.mxu0 %v551_v28  ;;  %645 = vmatpush1.bf16.msra.mxu1 %v553_v9  ;;  %v465_v37 = vsel %vm176_vm6, %v4723_v32, %v4724_v31  ;;  %v466_v38 = vsel %vm176_vm6, %v4684_v22, %v4723_v32  ;;  %v468_v42 = vsel %vm176_vm6, %v4724_v31, %v4683_v26  ;;  %v4758_v16 = vld [vmem:[%s6360_s5 + $0xa0] sm:$0xff]   ;;  %v4759_v9 = vld [vmem:[%s6360_s5 + $0x68] sm:$0xff]   ;;  %v4766_v28 = vld [vmem:[%s6360_s5 + $0xb0] sm:$0xff]  }
 0x22a   :  { %v4727_v33 = vpop.permute.xlu1 %4726  ;;  %v4762_v23 = vld [vmem:[%s6360_s5 + $0xa8] sm:$0xff]   ;;  %v4768_v31 = vld [vmem:[%s6360_s5 + $0x38] sm:$0xff]   ;;  %v4771_v22 = vld [vmem:[%s6360_s5 + $0x140] sm:$0xff]  }
 0x22b   :  { %v4729_v34 = vunpack.i.h.bf16 %v4727_v33  ;;  %v4728_v35 = vunpack.i.l.bf16 %v4727_v33  ;;  %v4770_v32 = vld [vmem:[%s6360_s5 + $0xb8] sm:$0xff]   ;;  %v4774_v26 = vld [vmem:[%s6360_s5 + $0x1c0] sm:$0xff]   ;;  %v5016_v33 = vmov 1966171168  }
 0x22d   :  { %v481_v41 = vsel %vm193_vm4, %v4728_v35, %v4729_v34  ;;  %v482_v36 = vsel %vm193_vm4, %v4689_v25, %v4728_v35  ;;  %v484_v43 = vsel %vm193_vm4, %v4729_v34, %v4688_v27  ;;  %v4764_v25 = vld [vmem:[%s6360_s5 + $0x30] sm:$0xff]   ;;  %v695_v34 = vunpack.c.l.s4 %v5016_v33 }
 0x22e   :  { %v557_v44 = vpack.c.bf16 %v481_v41, %v465_v37  ;;  %v4732_v45 = vpop.permute.xlu1 %4731  ;;  %v556_v46 = vpack.c.bf16 %v482_v36, %v466_v38  ;;  %v558_v47 = vpack.c.bf16 %v484_v43, %v468_v42  ;;  %v4765_v27 = vld [vmem:[%s6360_s5 + $0xf0] sm:$0xff]   ;;  %v698_v37 = vshrl.u32 %v53_v6, 7 }
 0x22f   :  { %v4734_v49 = vunpack.i.h.bf16 %v4732_v45  ;;  %v4733_v50 = vunpack.i.l.bf16 %v4732_v45  ;;  %v696_v35 = vunpack.c.0.s8 %v695_v34  ;;  %v5017_v38 = vmov 1983009808  }
 0x230   :  { %603 = vmatprep.subr.bf16.mxu0 %v556_v46  ;;  %646 = vmatprep.subr.bf16.mxu1 %v558_v47  ;;  %v1016_v39 = vunpack.c.l.s4 %v5017_v38 }
 0x231   :  { %v500_v55 = vsel %vm222_vm7, %v4734_v49, %v4693_v30  ;;  %v498_v57 = vsel %vm222_vm7, %v4694_v29, %v4733_v50  ;;  %604 = vmatpush1.bf16.msra.mxu0 %v555_v51  ;;  %647 = vmatpush1.bf16.msra.mxu1 %v557_v44  ;;  %v497_v56 = vsel %vm222_vm7, %v4733_v50, %v4734_v49  ;;  %v4767_v29 = vld [vmem:[%s6360_s5 + $0x78] sm:$0xff]  }
 0x232   :  { %v562_v58 = vpack.c.bf16 %v500_v55, %v500_v55  ;;  %v560_v59 = vpack.c.bf16 %v498_v57, %v498_v57  ;;  %v561_v60 = vpack.c.bf16 %v497_v56, %v497_v56  ;;  %v4769_v30 = vld [vmem:[%s6360_s5 + $0xf8] sm:$0xff]   ;;  %v5471_v47 = vsub.s32 %v696_v35, %v698_v37 }
 0x233   :  { %v1017_v48 = vunpack.c.0.s8 %v1016_v39 }
 0x234   :  { %4005 = vmatprep.subr.msk.bf16.mxu0 %vm584_vm10, %v560_v59  ;;  %4007 = vmatprep.subr.msk.bf16.mxu1 %vm584_vm10, %v562_v58  ;;  %v592_v0 = vsel %vm584_vm10, %v561_v60, 0 }
 0x235   :  { %606 = vmatpush1.bf16.msra.mxu0 %v586_v7  ;;  %649 = vmatpush1.bf16.msra.mxu1 %v592_v0 }
 0x236   :  { %4272 = vmatprep.subr.bf16.mxu0 %v4739_v52  ;;  %4294 = vmatprep.subr.bf16.mxu1 %v4741_v54 }
 0x238   :  { %4006 = vmatmul.mubr.msk.bf16.vlgmr.msra.gmra.mrb[0].mxu0 %vm580_vm11, %v4738_v61  ;;  %4008 = vmatmul.mubr.msk.bf16.vlgmr.msra.gmra.mrb[8].mxu1 %vm580_vm11, %v4738_v61 }
 0x239   :  { %4273 = vmatpush3.bf16.msra.mxu0 %v4740_v62  ;;  %4295 = vmatpush3.bf16.msra.mxu1 %v4742_v63 }
 0x23a   :  { %4274 = vmatprep.subr.bf16.mxu0 %v4743_v1  ;;  %4296 = vmatprep.subr.bf16.mxu1 %v4745_v3 }
 0x23d   :  { %4275 = vmatpush3.bf16.msra.mxu0 %v4744_v2  ;;  %4297 = vmatpush3.bf16.msra.mxu1 %v4746_v5 }
 0x23e   :  { %4276 = vmatprep.subr.bf16.mxu0 %v4747_v10  ;;  %4298 = vmatprep.subr.bf16.mxu1 %v4749_v12  ;;  %v5478_v10 = vsub.s32 %v1017_v48, %v698_v37 }
 0x23f   :  { %v573_v41 = vpop.permute.xlu1 %572 }
 0x241   :  { %4277 = vmatpush3.bf16.msra.mxu0 %v4748_v11  ;;  %4299 = vmatpush3.bf16.msra.mxu1 %v4750_v13 }
 0x242   :  { %4278 = vmatprep.subr.bf16.mxu0 %v4751_v4  ;;  %4300 = vmatprep.subr.bf16.mxu1 %v4753_v15 }
 0x245   :  { %4279 = vmatpush3.bf16.msra.mxu0 %v4752_v14  ;;  %4301 = vmatpush3.bf16.msra.mxu1 %v4754_v18 }
 0x246   :  { %4280 = vmatprep.subr.bf16.mxu0 %v4755_v19  ;;  %4302 = vmatprep.subr.bf16.mxu1 %v4757_v8 }
 0x249   :  { %4281 = vmatpush3.bf16.msra.mxu0 %v4756_v20  ;;  %4303 = vmatpush3.bf16.msra.mxu1 %v4758_v16 }
 0x24a   :  { %4282 = vmatprep.subr.bf16.mxu0 %v4759_v9  ;;  %4304 = vmatprep.subr.bf16.mxu1 %v4761_v21 }
 0x24d   :  { %4283 = vmatpush3.bf16.msra.mxu0 %v4760_v17  ;;  %4305 = vmatpush3.bf16.msra.mxu1 %v4762_v23 }
 0x24e   :  { %4284 = vmatprep.subr.bf16.mxu0 %v4763_v24  ;;  %4306 = vmatprep.subr.bf16.mxu1 %v4765_v27 }
 0x251   :  { %4285 = vmatpush3.bf16.msra.mxu0 %v4764_v25  ;;  %4307 = vmatpush3.bf16.msra.mxu1 %v4766_v28 }
 0x252   :  { %4286 = vmatprep.subr.bf16.mxu0 %v4767_v29  ;;  %4308 = vmatprep.subr.bf16.mxu1 %v4769_v30 }
 0x255   :  { %4287 = vmatpush3.bf16.msra.mxu0 %v4768_v31  ;;  %4309 = vmatpush3.bf16.msra.mxu1 %v4770_v32 }
 0x256   :  { %4316 = vmatprep.subr.bf16.mxu0 %v4771_v22  ;;  %4338 = vmatprep.subr.bf16.mxu1 %v4774_v26 }
 0x30b   :  { %v631_v36 = vpop.f32.mrb[0].mxu0  ;;  %v674_v42 = vpop.f32.mrb[8].mxu1 }
 0x30c   :  { %v632_v43 = vadd.f32 %v631_v36, %v568_v40  ;;  %v675_v44 = vadd.f32 %v674_v42, %v568_v40  ;;  %v633_v45 = vpop.f32.mrb[1].mxu0  ;;  %v676_v46 = vpop.f32.mrb[9].mxu1 }
 0x30d   :  { %v634_v49 = vadd.f32 %v633_v45, %v568_v40  ;;  %v677_v50 = vadd.f32 %v676_v46, %v568_v40  ;;  %v635_v51 = vpop.f32.mrb[2].mxu0  ;;  %v678_v53 = vpop.f32.mrb[10].mxu1 }
 0x30e   :  { %v683_v52 = vmax.f32 %v632_v43, 0.0  ;;  %v685_v54 = vmax.f32 %v675_v44, 0.0  ;;  %v636_v55 = vadd.f32 %v635_v51, %v573_v41  ;;  %v679_v57 = vadd.f32 %v678_v53, %v573_v41  ;;  %v637_v56 = vpop.f32.mrb[3].mxu0  ;;  %v680_v58 = vpop.f32.mrb[11].mxu1 }
 0x30f   :  { %v684_v59 = vmax.f32 %v634_v49, 0.0  ;;  %v686_v60 = vmax.f32 %v677_v50, 0.0  ;;  %v638_v61 = vadd.f32 %v637_v56, %v573_v41  ;;  %v681_v62 = vadd.f32 %v680_v58, %v573_v41 }
 0x310   :  { %v687_v63 = vmax.f32 %v636_v55, 0.0  ;;  %v689_v7 = vmax.f32 %v679_v57, 0.0 }
 0x311   :  { %v693_v0 = vcombine.low %v683_v52, %v684_v59  ;;  %v733_v1 = vcombine.high %v683_v52, %v684_v59  ;;  %v848_v2 = vcombine.low %v685_v54, %v686_v60  ;;  %v885_v3 = vcombine.high %v685_v54, %v686_v60 }
 0x312   :  { %v688_v11 = vmax.f32 %v638_v61, 0.0  ;;  %v690_v12 = vmax.f32 %v681_v62, 0.0 }
 0x313   :  { %v700_v13 = vrot.slane %v693_v0, %v5471_v47  ;;  %v740_v4 = vrot.slane %v733_v1, %v5471_v47  ;;  %v855_v14 = vrot.slane %v848_v2, %v5471_v47  ;;  %v892_v15 = vrot.slane %v885_v3, %v5471_v47 }
 0x314   :  { %v772_v18 = vcombine.low %v687_v63, %v688_v11  ;;  %v809_v19 = vcombine.high %v687_v63, %v688_v11  ;;  %v924_v20 = vcombine.low %v689_v7, %v690_v12  ;;  %v961_v8 = vcombine.high %v689_v7, %v690_v12  ;;  %v4772_v12 = vld [vmem:[%s6360_s5 + $0x100] sm:$0xff]  }
 0x315   :  { %v707_v6 = vrot.slane %v700_v13, %v5471_v47  ;;  %v714_v16 = vcombine.high %v700_v13, %v700_v13  ;;  %v747_v9 = vrot.slane %v740_v4, %v5471_v47  ;;  %v751_v17 = vcombine.high %v740_v4, %v740_v4 }
 0x316   :  { %v862_v21 = vrot.slane %v855_v14, %v5471_v47  ;;  %v866_v23 = vcombine.high %v855_v14, %v855_v14  ;;  %v899_v24 = vrot.slane %v892_v15, %v5471_v47  ;;  %v903_v25 = vcombine.high %v892_v15, %v892_v15 }
 0x317   :  { %713 = vst.msk [vmem:[#allocation4] ss:$2 sm:$0x3] %vm5474_vm12, %v707_v6  ;;  %v721_v27 = vrot.slane %v714_v16, %v5471_v47  ;;  %v725_v28 = vcombine.high %v707_v6, %v707_v6  ;;  %750 = vst.msk [vmem:[#allocation4 + $0x10] ss:$2 sm:$0x3] %vm5474_vm12, %v747_v9  ;;  %v758_v29 = vrot.slane %v751_v17, %v5471_v47 }
 0x318   :  { %v762_v30 = vcombine.high %v747_v9, %v747_v9  ;;  %865 = vst.msk [vmem:[#allocation4 + $0x1] ss:$2 sm:$0x3] %vm5474_vm12, %v862_v21  ;;  %v873_v31 = vrot.slane %v866_v23, %v5471_v47  ;;  %v877_v32 = vcombine.high %v862_v21, %v862_v21  ;;  %902 = vst.msk [vmem:[#allocation4 + $0x11] ss:$2 sm:$0x3] %vm5474_vm12, %v899_v24 }
 0x319   :  { %v910_v22 = vrot.slane %v903_v25, %v5471_v47  ;;  %v914_v26 = vcombine.high %v899_v24, %v899_v24  ;;  %724 = vst.msk [vmem:[#allocation4 + $0x4] ss:$2 sm:$0x3] %vm5474_vm12, %v721_v27  ;;  %728 = vst.msk [vmem:[#allocation4 + $0x8] ss:$2 sm:$0x3] %vm5474_vm12, %v725_v28  ;;  %v729_v33 = vcombine.high %v721_v27, %v721_v27 }
 0x31a   :  { %761 = vst.msk [vmem:[#allocation4 + $0x14] ss:$2 sm:$0x3] %vm5474_vm12, %v758_v29  ;;  %765 = vst.msk [vmem:[#allocation4 + $0x18] ss:$2 sm:$0x3] %vm5474_vm12, %v762_v30  ;;  %v766_v34 = vcombine.high %v758_v29, %v758_v29  ;;  %v779_v35 = vrot.slane %v772_v18, %v5471_v47  ;;  %v816_v37 = vrot.slane %v809_v19, %v5471_v47 }
 0x31b   :  { %876 = vst.msk [vmem:[#allocation4 + $0x5] ss:$2 sm:$0x3] %vm5474_vm12, %v873_v31  ;;  %880 = vst.msk [vmem:[#allocation4 + $0x9] ss:$2 sm:$0x3] %vm5474_vm12, %v877_v32  ;;  %v881_v38 = vcombine.high %v873_v31, %v873_v31  ;;  %v918_v39 = vcombine.high %v910_v22, %v910_v22  ;;  %v931_v40 = vrot.slane %v924_v20, %v5471_v47 }
 0x31c   :  { %913 = vst.msk [vmem:[#allocation4 + $0x15] ss:$2 sm:$0x3] %vm5474_vm12, %v910_v22  ;;  %917 = vst.msk [vmem:[#allocation4 + $0x19] ss:$2 sm:$0x3] %vm5474_vm12, %v914_v26  ;;  %v968_v41 = vrot.slane %v961_v8, %v5471_v47  ;;  %v786_v36 = vrot.slane %v779_v35, %v5471_v47  ;;  %v790_v42 = vcombine.high %v779_v35, %v779_v35 }
 0x31d   :  { %732 = vst.msk [vmem:[#allocation4 + $0xc] ss:$2 sm:$0x3] %vm5474_vm12, %v729_v33  ;;  %769 = vst.msk [vmem:[#allocation4 + $0x1c] ss:$2 sm:$0x3] %vm5474_vm12, %v766_v34  ;;  %v823_v43 = vrot.slane %v816_v37, %v5471_v47  ;;  %v827_v44 = vcombine.high %v816_v37, %v816_v37  ;;  %v938_v45 = vrot.slane %v931_v40, %v5471_v47 }
 0x31e   :  { %884 = vst.msk [vmem:[#allocation4 + $0xd] ss:$2 sm:$0x3] %vm5474_vm12, %v881_v38  ;;  %921 = vst.msk [vmem:[#allocation4 + $0x1d] ss:$2 sm:$0x3] %vm5474_vm12, %v918_v39  ;;  %v942_v46 = vcombine.high %v931_v40, %v931_v40  ;;  %v975_v48 = vrot.slane %v968_v41, %v5471_v47  ;;  %v979_v49 = vcombine.high %v968_v41, %v968_v41 }
 0x31f   :  { %789 = vst.msk [vmem:[#allocation4 + $0x20] ss:$2 sm:$0x3] %vm5474_vm12, %v786_v36  ;;  %v797_v50 = vrot.slane %v790_v42, %v5471_v47  ;;  %v801_v51 = vcombine.high %v786_v36, %v786_v36  ;;  %826 = vst.msk [vmem:[#allocation4 + $0x30] ss:$2 sm:$0x3] %vm5474_vm12, %v823_v43  ;;  %v834_v53 = vrot.slane %v827_v44, %v5471_v47 }
 0x320   :  { %v838_v52 = vcombine.high %v823_v43, %v823_v43  ;;  %941 = vst.msk [vmem:[#allocation4 + $0x21] ss:$2 sm:$0x3] %vm5474_vm12, %v938_v45  ;;  %v949_v54 = vrot.slane %v942_v46, %v5471_v47  ;;  %v953_v55 = vcombine.high %v938_v45, %v938_v45  ;;  %978 = vst.msk [vmem:[#allocation4 + $0x31] ss:$2 sm:$0x3] %vm5474_vm12, %v975_v48 }
 0x321   :  { %v986_v57 = vrot.slane %v979_v49, %v5471_v47  ;;  %v990_v56 = vcombine.high %v975_v48, %v975_v48  ;;  %800 = vst.msk [vmem:[#allocation4 + $0x24] ss:$2 sm:$0x3] %vm5474_vm12, %v797_v50  ;;  %804 = vst.msk [vmem:[#allocation4 + $0x28] ss:$2 sm:$0x3] %vm5474_vm12, %v801_v51  ;;  %v805_v58 = vcombine.high %v797_v50, %v797_v50 }
 0x322   :  { %837 = vst.msk [vmem:[#allocation4 + $0x34] ss:$2 sm:$0x3] %vm5474_vm12, %v834_v53  ;;  %841 = vst.msk [vmem:[#allocation4 + $0x38] ss:$2 sm:$0x3] %vm5474_vm12, %v838_v52  ;;  %v842_v59 = vcombine.high %v834_v53, %v834_v53  ;;  %v957_v47 = vcombine.high %v949_v54, %v949_v54 }
 0x323   :  { %952 = vst.msk [vmem:[#allocation4 + $0x25] ss:$2 sm:$0x3] %vm5474_vm12, %v949_v54  ;;  %956 = vst.msk [vmem:[#allocation4 + $0x29] ss:$2 sm:$0x3] %vm5474_vm12, %v953_v55  ;;  %v994_v60 = vcombine.high %v986_v57, %v986_v57 }
 0x324   :  { %989 = vst.msk [vmem:[#allocation4 + $0x35] ss:$2 sm:$0x3] %vm5474_vm12, %v986_v57  ;;  %993 = vst.msk [vmem:[#allocation4 + $0x39] ss:$2 sm:$0x3] %vm5474_vm12, %v990_v56 }
 0x325   :  { %808 = vst.msk [vmem:[#allocation4 + $0x2c] ss:$2 sm:$0x3] %vm5474_vm12, %v805_v58  ;;  %845 = vst.msk [vmem:[#allocation4 + $0x3c] ss:$2 sm:$0x3] %vm5474_vm12, %v842_v59 }
 0x326   :  { %v998_v61 = vld [vmem:[#allocation4] sm:$0xff]  ;;  %960 = vst.msk [vmem:[#allocation4 + $0x2d] ss:$2 sm:$0x3] %vm5474_vm12, %v957_v47  ;;  %v999_v7 = vld [vmem:[#allocation4 + $0x8] sm:$0xff]  ;;  %v4781_v21 = vld [vmem:[%s6360_s5 + $0x150] sm:$0xff]  }
 0x327   :  { %997 = vst.msk [vmem:[#allocation4 + $0x3d] ss:$2 sm:$0x3] %vm5474_vm12, %v994_v60  ;;  %v1021_v62 = vrot.slane %v998_v61, %v5478_v10  ;;  %v1014_v63 = vcombine.high %v998_v61, %v998_v61  ;;  %v5571_v2 = vrot.slane %v999_v7, %v5478_v10  ;;  %v1031_v3 = vcombine.high %v999_v7, %v999_v7  ;;  %v4775_v19 = vld [vmem:[%s6360_s5 + $0x180] sm:$0xff]   ;;  %v4776_v20 = vld [vmem:[%s6360_s5 + $0x148] sm:$0xff]   ;;  %v4783_v24 = vld [vmem:[%s6360_s5 + $0x1d0] sm:$0xff]  }
 0x328   :  { %v4779_v16 = vld [vmem:[%s6360_s5 + $0x1c8] sm:$0xff]   ;;  %v4782_v25 = vld [vmem:[%s6360_s5 + $0x110] sm:$0xff]   ;;  %v4785_v27 = vld [vmem:[%s6360_s5 + $0x158] sm:$0xff]  }
 0x329   :  { %v1029_v0 = vcombine.high %v1021_v62, %v1021_v62  ;;  %v1028_v1 = vrot.slane %v1014_v63, %v5478_v10  ;;  %v1046_v5 = vcombine.high %v5571_v2, %v5571_v2  ;;  %v1182_v4 = vpack.c.bf16 %v1021_v62, %v1021_v62  ;;  %v4778_v9 = vld [vmem:[%s6360_s5 + $0x108] sm:$0xff]   ;;  %v4784_v28 = vld [vmem:[%s6360_s5 + $0x190] sm:$0xff]   ;;  %v4787_v29 = vld [vmem:[%s6360_s5 + $0x1d8] sm:$0xff]  }
 0x32a   :  { %v5579_v14 = vrot.slane %v1031_v3, %v5478_v10  ;;  %v4780_v23 = vld [vmem:[%s6360_s5 + $0x188] sm:$0xff]   ;;  %v4786_v30 = vld [vmem:[%s6360_s5 + $0x118] sm:$0xff]   ;;  %v4789_v31 = vld [vmem:[%s6360_s5 + $0x160] sm:$0xff]   ;;  %v1186_v57 = vpack.c.bf16 %v5571_v2, %v5571_v2 }
 0x32b   :  { %v1183_v11 = vpack.c.bf16 %v1029_v0, %v1029_v0  ;;  %v1030_v13 = vcombine.high %v1028_v1, %v1028_v1  ;;  %v1187_v18 = vpack.c.bf16 %v1046_v5, %v1046_v5  ;;  %v1184_v8 = vpack.c.bf16 %v1028_v1, %v1028_v1  ;;  %v4788_v32 = vld [vmem:[%s6360_s5 + $0x198] sm:$0xff]   ;;  %v4791_v22 = vld [vmem:[%s6360_s5 + $0x1e0] sm:$0xff]   ;;  %v4793_v33 = vld [vmem:[%s6360_s5 + $0x168] sm:$0xff]  }
 0x32c   :  { %v1047_v6 = vcombine.high %v5579_v14, %v5579_v14  ;;  %v4790_v26 = vld [vmem:[%s6360_s5 + $0x120] sm:$0xff]   ;;  %v4795_v35 = vld [vmem:[%s6360_s5 + $0x1e8] sm:$0xff]   ;;  %v4797_v38 = vld [vmem:[%s6360_s5 + $0x170] sm:$0xff]   ;;  %v1188_v47 = vpack.c.bf16 %v5579_v14, %v5579_v14 }
 0x32d   :  { %3301 = vmatprep.mubr.bf16.mxu0 %v1183_v11  ;;  %v1185_v15 = vpack.c.bf16 %v1030_v13, %v1030_v13  ;;  %v4792_v34 = vld [vmem:[%s6360_s5 + $0x1a0] sm:$0xff]   ;;  %v4794_v37 = vld [vmem:[%s6360_s5 + $0x128] sm:$0xff]   ;;  %v1000_v39 = vld [vmem:[#allocation4 + $0x10] sm:$0xff] }
 0x32e   :  { %3302 = vmatmul.mubr.bf16.vlgmr.msra.gmra.mrb[4].mxu0 %v1182_v4  ;;  %v1189_v17 = vpack.c.bf16 %v1047_v6, %v1047_v6  ;;  %v4796_v40 = vld [vmem:[%s6360_s5 + $0x1a8] sm:$0xff]   ;;  %v4799_v41 = vld [vmem:[%s6360_s5 + $0x1f0] sm:$0xff]   ;;  %v1048_v42 = vcombine.high %v1000_v39, %v1000_v39  ;;  %v4801_v43 = vld [vmem:[%s6360_s5 + $0x178] sm:$0xff]   ;;  %v5662_v45 = vrot.slane %v1000_v39, %v5478_v10 }
 0x32f   :  { %4317 = vmatpush3.bf16.msra.mxu0 %v4772_v12  ;;  %3341 = vmatprep.mubr.bf16.mxu1 %v1185_v15  ;;  %v4798_v36 = vld [vmem:[%s6360_s5 + $0x130] sm:$0xff]   ;;  %v4803_v46 = vld [vmem:[%s6360_s5 + $0x1f8] sm:$0xff]   ;;  %v4805_v50 = vld [vmem:[%s6360_s5 + $0x240] sm:$0xff]  }
 0x330   :  { %3381 = vmatprep.mubr.bf16.mxu0 %v1187_v18  ;;  %3342 = vmatmul.mubr.bf16.vlgmr.msra.gmra.mrb[12].mxu1 %v1184_v8  ;;  %v4800_v44 = vld [vmem:[%s6360_s5 + $0x1b0] sm:$0xff]   ;;  %v4802_v48 = vld [vmem:[%s6360_s5 + $0x138] sm:$0xff]   ;;  %v5671_v49 = vrot.slane %v1048_v42, %v5478_v10  ;;  %v1063_v53 = vcombine.high %v5662_v45, %v5662_v45  ;;  %v4807_v52 = vld [vmem:[%s6360_s5 + $0x2c0] sm:$0xff]  }
 0x331   :  { %4339 = vmatpush3.bf16.msra.mxu1 %v4775_v19  ;;  %4318 = vmatprep.subr.bf16.mxu0 %v4776_v20  ;;  %v4804_v51 = vld [vmem:[%s6360_s5 + $0x1b8] sm:$0xff]   ;;  %v4806_v54 = vld [vmem:[%s6360_s5 + $0x200] sm:$0xff]   ;;  %v4810_v56 = vld [vmem:[%s6360_s5 + $0x248] sm:$0xff]  }
 0x332   :  { %3421 = vmatprep.mubr.bf16.mxu1 %v1189_v17  ;;  %4340 = vmatprep.subr.bf16.mxu1 %v4779_v16  ;;  %v1064_v55 = vcombine.high %v5671_v49, %v5671_v49  ;;  %v1191_v58 = vpack.c.bf16 %v1063_v53, %v1063_v53  ;;  %v4808_v59 = vld [vmem:[%s6360_s5 + $0x280] sm:$0xff]   ;;  %v4812_v60 = vld [vmem:[%s6360_s5 + $0x2c8] sm:$0xff]   ;;  %v4814_v63 = vld [vmem:[%s6360_s5 + $0x250] sm:$0xff]   ;;  %v1192_v39 = vpack.c.bf16 %v5671_v49, %v5671_v49 }
 0x333   :  { %4319 = vmatpush3.bf16.msra.mxu0 %v4778_v9  ;;  %v4811_v62 = vld [vmem:[%s6360_s5 + $0x208] sm:$0xff]   ;;  %v4816_v0 = vld [vmem:[%s6360_s5 + $0x2d0] sm:$0xff]   ;;  %v4818_v2 = vld [vmem:[%s6360_s5 + $0x258] sm:$0xff]  }
 0x334   :  { %4320 = vmatprep.subr.bf16.mxu0 %v4781_v21  ;;  %v1193_v61 = vpack.c.bf16 %v1064_v55, %v1064_v55  ;;  %v4813_v7 = vld [vmem:[%s6360_s5 + $0x288] sm:$0xff]   ;;  %v4815_v1 = vld [vmem:[%s6360_s5 + $0x210] sm:$0xff]   ;;  %v4820_v11 = vld [vmem:[%s6360_s5 + $0x2d8] sm:$0xff]  }
 0x335   :  { %4341 = vmatpush3.bf16.msra.mxu1 %v4780_v23  ;;  %v4817_v3 = vld [vmem:[%s6360_s5 + $0x290] sm:$0xff]   ;;  %v4819_v12 = vld [vmem:[%s6360_s5 + $0x218] sm:$0xff]   ;;  %v4822_v13 = vld [vmem:[%s6360_s5 + $0x260] sm:$0xff]  }
 0x336   :  { %4342 = vmatprep.subr.bf16.mxu1 %v4783_v24  ;;  %v4821_v5 = vld [vmem:[%s6360_s5 + $0x298] sm:$0xff]   ;;  %v4824_v4 = vld [vmem:[%s6360_s5 + $0x2e0] sm:$0xff]   ;;  %v4826_v15 = vld [vmem:[%s6360_s5 + $0x268] sm:$0xff]  }
 0x337   :  { %4321 = vmatpush3.bf16.msra.mxu0 %v4782_v25  ;;  %v4823_v14 = vld [vmem:[%s6360_s5 + $0x220] sm:$0xff]   ;;  %v4828_v19 = vld [vmem:[%s6360_s5 + $0x2e8] sm:$0xff]   ;;  %v4830_v8 = vld [vmem:[%s6360_s5 + $0x270] sm:$0xff]  }
 0x338   :  { %4322 = vmatprep.subr.bf16.mxu0 %v4785_v27  ;;  %v4825_v18 = vld [vmem:[%s6360_s5 + $0x2a0] sm:$0xff]   ;;  %v4827_v20 = vld [vmem:[%s6360_s5 + $0x228] sm:$0xff]   ;;  %v1001_v6 = vld [vmem:[#allocation4 + $0x18] sm:$0xff] }
 0x339   :  { %4343 = vmatpush3.bf16.msra.mxu1 %v4784_v28  ;;  %v4829_v16 = vld [vmem:[%s6360_s5 + $0x2a8] sm:$0xff]   ;;  %v4832_v9 = vld [vmem:[%s6360_s5 + $0x2f0] sm:$0xff]   ;;  %v1065_v21 = vcombine.high %v1001_v6, %v1001_v6  ;;  %v4834_v23 = vld [vmem:[%s6360_s5 + $0x278] sm:$0xff]   ;;  %v5772_v25 = vrot.slane %v1001_v6, %v5478_v10 }
 0x33a   :  { %4344 = vmatprep.subr.bf16.mxu1 %v4787_v29  ;;  %v4831_v17 = vld [vmem:[%s6360_s5 + $0x230] sm:$0xff]   ;;  %v4836_v27 = vld [vmem:[%s6360_s5 + $0x2f8] sm:$0xff]   ;;  %v4859_v55 = vld [vmem:[%s6360_s5 + $0x368] sm:$0xff]  }
 0x33b   :  { %4323 = vmatpush3.bf16.msra.mxu0 %v4786_v30  ;;  %v4833_v24 = vld [vmem:[%s6360_s5 + $0x2b0] sm:$0xff]   ;;  %v4835_v28 = vld [vmem:[%s6360_s5 + $0x238] sm:$0xff]   ;;  %v5781_v29 = vrot.slane %v1065_v21, %v5478_v10  ;;  %v4838_v30 = vld [vmem:[%s6360_s5 + $0x340] sm:$0xff]  }
 0x33c   :  { %4324 = vmatprep.subr.bf16.mxu0 %v4789_v31  ;;  %v4837_v31 = vld [vmem:[%s6360_s5 + $0x2b8] sm:$0xff]   ;;  %v4847_v42 = vld [vmem:[%s6360_s5 + $0x350] sm:$0xff]  }
 0x33d   :  { %4345 = vmatpush3.bf16.msra.mxu1 %v4788_v32  ;;  %v1080_v32 = vcombine.high %v5772_v25, %v5772_v25  ;;  %v4853_v49 = vld [vmem:[%s6360_s5 + $0x3d8] sm:$0xff]   ;;  %v1196_v6 = vpack.c.bf16 %v5781_v29, %v5781_v29  ;;  %v4880_v21 = vld [vmem:[%s6360_s5 + $0x450] sm:$0xff]  }
 0x33e   :  { %4346 = vmatprep.subr.bf16.mxu1 %v4791_v22  ;;  %v4840_v22 = vld [vmem:[%s6360_s5 + $0x3c0] sm:$0xff]   ;;  %v4854_v53 = vld [vmem:[%s6360_s5 + $0x398] sm:$0xff]  }
 0x33f   :  { %4325 = vmatpush3.bf16.msra.mxu0 %v4790_v26  ;;  %v4839_v26 = vld [vmem:[%s6360_s5 + $0x300] sm:$0xff]  }
 0x340   :  { %4326 = vmatprep.subr.bf16.mxu0 %v4793_v33  ;;  %v1081_v33 = vcombine.high %v5781_v29, %v5781_v29  ;;  %v4886_v29 = vld [vmem:[%s6360_s5 + $0x4d8] sm:$0xff]  }
 0x341   :  { %4347 = vmatpush3.bf16.msra.mxu1 %v4792_v34  ;;  %v1190_v34 = vpack.c.bf16 %v5662_v45, %v5662_v45  ;;  %v4848_v45 = vld [vmem:[%s6360_s5 + $0x310] sm:$0xff]  }
 0x342   :  { %4348 = vmatprep.subr.bf16.mxu1 %v4795_v35  ;;  %v4843_v35 = vld [vmem:[%s6360_s5 + $0x348] sm:$0xff]  }
 0x343   :  { %4327 = vmatpush3.bf16.msra.mxu0 %v4794_v37  ;;  %v1195_v37 = vpack.c.bf16 %v1080_v32, %v1080_v32  ;;  %v4887_v32 = vld [vmem:[%s6360_s5 + $0x498] sm:$0xff]  }
 0x344   :  { %4328 = vmatprep.subr.bf16.mxu0 %v4797_v38  ;;  %v4841_v38 = vld [vmem:[%s6360_s5 + $0x380] sm:$0xff]  }
 0x345   :  { %4349 = vmatpush3.bf16.msra.mxu1 %v4796_v40  ;;  %v4845_v40 = vld [vmem:[%s6360_s5 + $0x3c8] sm:$0xff]  }
 0x346   :  { %4350 = vmatprep.subr.bf16.mxu1 %v4799_v41  ;;  %v1197_v41 = vpack.c.bf16 %v1081_v33, %v1081_v33  ;;  %v4892_v33 = vld [vmem:[%s6360_s5 + $0x468] sm:$0xff]  }
 0x347   :  { %4329 = vmatpush3.bf16.msra.mxu0 %v4798_v36  ;;  %v4844_v36 = vld [vmem:[%s6360_s5 + $0x308] sm:$0xff]  }
 0x348   :  { %4330 = vmatprep.subr.bf16.mxu0 %v4801_v43  ;;  %v4846_v43 = vld [vmem:[%s6360_s5 + $0x388] sm:$0xff]  }
 0x349   :  { %4351 = vmatpush3.bf16.msra.mxu1 %v4800_v44  ;;  %v4849_v44 = vld [vmem:[%s6360_s5 + $0x3d0] sm:$0xff]  }
 0x34a   :  { %4352 = vmatprep.subr.bf16.mxu1 %v4803_v46  ;;  %v4851_v46 = vld [vmem:[%s6360_s5 + $0x358] sm:$0xff]  }
 0x34b   :  { %4331 = vmatpush3.bf16.msra.mxu0 %v4802_v48  ;;  %v4850_v48 = vld [vmem:[%s6360_s5 + $0x390] sm:$0xff]  }
 0x34c   :  { %4360 = vmatprep.subr.bf16.mxu0 %v4805_v50  ;;  %v4852_v50 = vld [vmem:[%s6360_s5 + $0x318] sm:$0xff]  }
 0x34d   :  { %4353 = vmatpush3.bf16.msra.mxu1 %v4804_v51  ;;  %v4855_v51 = vld [vmem:[%s6360_s5 + $0x360] sm:$0xff]  }
 0x34e   :  { %3382 = vmatmul.mubr.bf16.vlgmr.msra.gmra.mrb[8].mxu0 %v1186_v57  ;;  %4382 = vmatprep.subr.bf16.mxu1 %v4807_v52  ;;  %v4857_v52 = vld [vmem:[%s6360_s5 + $0x3e0] sm:$0xff]  }
 0x34f   :  { %4361 = vmatpush3.bf16.msra.mxu0 %v4806_v54  ;;  %3461 = vmatprep.mubr.bf16.mxu0 %v1191_v58  ;;  %v4856_v54 = vld [vmem:[%s6360_s5 + $0x320] sm:$0xff]   ;;  %v4860_v58 = vld [vmem:[%s6360_s5 + $0x328] sm:$0xff]  }
 0x350   :  { %3422 = vmatmul.mubr.bf16.vlgmr.msra.gmra.mrb[16].mxu1 %v1188_v47  ;;  %4362 = vmatprep.subr.bf16.mxu0 %v4810_v56  ;;  %v4858_v57 = vld [vmem:[%s6360_s5 + $0x3a0] sm:$0xff]   ;;  %v4861_v56 = vld [vmem:[%s6360_s5 + $0x3e8] sm:$0xff]  }
 0x351   :  { %4383 = vmatpush3.bf16.msra.mxu1 %v4808_v59  ;;  %3501 = vmatprep.mubr.bf16.mxu1 %v1193_v61  ;;  %v4863_v59 = vld [vmem:[%s6360_s5 + $0x370] sm:$0xff]   ;;  %v1002_v47 = vld [vmem:[#allocation4 + $0x20] sm:$0xff] }
 0x352   :  { %4384 = vmatprep.subr.bf16.mxu1 %v4812_v60  ;;  %v4862_v60 = vld [vmem:[%s6360_s5 + $0x3a8] sm:$0xff]   ;;  %v4865_v61 = vld [vmem:[%s6360_s5 + $0x3f0] sm:$0xff]  }
 0x353   :  { %4363 = vmatpush3.bf16.msra.mxu0 %v4811_v62  ;;  %v4864_v62 = vld [vmem:[%s6360_s5 + $0x330] sm:$0xff]  }
 0x354   :  { %4364 = vmatprep.subr.bf16.mxu0 %v4814_v63  ;;  %v1082_v63 = vcombine.high %v1002_v47, %v1002_v47 }
 0x355   :  { %4385 = vmatpush3.bf16.msra.mxu1 %v4813_v7  ;;  %v4867_v7 = vld [vmem:[%s6360_s5 + $0x378] sm:$0xff]  }
 0x356   :  { %4386 = vmatprep.subr.bf16.mxu1 %v4816_v0  ;;  %v4866_v0 = vld [vmem:[%s6360_s5 + $0x3b0] sm:$0xff]  }
 0x357   :  { %4365 = vmatpush3.bf16.msra.mxu0 %v4815_v1  ;;  %v5882_v1 = vrot.slane %v1002_v47, %v5478_v10 }
 0x358   :  { %4366 = vmatprep.subr.bf16.mxu0 %v4818_v2  ;;  %v4869_v2 = vld [vmem:[%s6360_s5 + $0x3f8] sm:$0xff]  }
 0x359   :  { %4387 = vmatpush3.bf16.msra.mxu1 %v4817_v3  ;;  %v4868_v3 = vld [vmem:[%s6360_s5 + $0x338] sm:$0xff]  }
 0x35a   :  { %4388 = vmatprep.subr.bf16.mxu1 %v4820_v11  ;;  %v5891_v11 = vrot.slane %v1082_v63, %v5478_v10  ;;  %v4913_v63 = vld [vmem:[%s6360_s5 + $0x550] sm:$0xff]  }
 0x35b   :  { %4367 = vmatpush3.bf16.msra.mxu0 %v4819_v12  ;;  %v4871_v12 = vld [vmem:[%s6360_s5 + $0x440] sm:$0xff]  }
 0x35c   :  { %4368 = vmatprep.subr.bf16.mxu0 %v4822_v13  ;;  %v4870_v13 = vld [vmem:[%s6360_s5 + $0x3b8] sm:$0xff]   ;;  %v1200_v47 = vpack.c.bf16 %v5891_v11, %v5891_v11 }
 0x35d   :  { %4389 = vmatpush3.bf16.msra.mxu1 %v4821_v5  ;;  %v1097_v5 = vcombine.high %v5882_v1, %v5882_v1 }
 0x35e   :  { %4390 = vmatprep.subr.bf16.mxu1 %v4824_v4  ;;  %v4873_v4 = vld [vmem:[%s6360_s5 + $0x4c0] sm:$0xff]  }
 0x35f   :  { %4369 = vmatpush3.bf16.msra.mxu0 %v4823_v14  ;;  %v4872_v14 = vld [vmem:[%s6360_s5 + $0x400] sm:$0xff]  }
 0x360   :  { %4370 = vmatprep.subr.bf16.mxu0 %v4826_v15  ;;  %v1098_v15 = vcombine.high %v5891_v11, %v5891_v11  ;;  %v4919_v11 = vld [vmem:[%s6360_s5 + $0x5d8] sm:$0xff]  }
 0x361   :  { %4391 = vmatpush3.bf16.msra.mxu1 %v4825_v18  ;;  %v1194_v18 = vpack.c.bf16 %v5772_v25, %v5772_v25  ;;  %v4881_v25 = vld [vmem:[%s6360_s5 + $0x410] sm:$0xff]  }
 0x362   :  { %4392 = vmatprep.subr.bf16.mxu1 %v4828_v19  ;;  %v4876_v19 = vld [vmem:[%s6360_s5 + $0x448] sm:$0xff]  }
 0x363   :  { %4371 = vmatpush3.bf16.msra.mxu0 %v4827_v20  ;;  %v1199_v20 = vpack.c.bf16 %v1097_v5, %v1097_v5  ;;  %v4920_v5 = vld [vmem:[%s6360_s5 + $0x598] sm:$0xff]  }
 0x364   :  { %4372 = vmatprep.subr.bf16.mxu0 %v4830_v8  ;;  %v4874_v8 = vld [vmem:[%s6360_s5 + $0x480] sm:$0xff]  }
 0x365   :  { %4393 = vmatpush3.bf16.msra.mxu1 %v4829_v16  ;;  %v4878_v16 = vld [vmem:[%s6360_s5 + $0x4c8] sm:$0xff]  }
 0x366   :  { %4394 = vmatprep.subr.bf16.mxu1 %v4832_v9  ;;  %v1201_v9 = vpack.c.bf16 %v1098_v15, %v1098_v15  ;;  %v4925_v15 = vld [vmem:[%s6360_s5 + $0x568] sm:$0xff]  }
 0x367   :  { %4373 = vmatpush3.bf16.msra.mxu0 %v4831_v17  ;;  %v4877_v17 = vld [vmem:[%s6360_s5 + $0x408] sm:$0xff]  }
 0x368   :  { %4374 = vmatprep.subr.bf16.mxu0 %v4834_v23  ;;  %v4879_v23 = vld [vmem:[%s6360_s5 + $0x488] sm:$0xff]  }
 0x369   :  { %4395 = vmatpush3.bf16.msra.mxu1 %v4833_v24  ;;  %v4882_v24 = vld [vmem:[%s6360_s5 + $0x4d0] sm:$0xff]  }
 0x36a   :  { %4396 = vmatprep.subr.bf16.mxu1 %v4836_v27  ;;  %v4884_v27 = vld [vmem:[%s6360_s5 + $0x458] sm:$0xff]  }
 0x36b   :  { %4375 = vmatpush3.bf16.msra.mxu0 %v4835_v28  ;;  %v4883_v28 = vld [vmem:[%s6360_s5 + $0x490] sm:$0xff]  }
 0x36c   :  { %4404 = vmatprep.subr.bf16.mxu0 %v4838_v30  ;;  %v4885_v30 = vld [vmem:[%s6360_s5 + $0x418] sm:$0xff]  }
 0x36d   :  { %4397 = vmatpush3.bf16.msra.mxu1 %v4837_v31  ;;  %v4888_v31 = vld [vmem:[%s6360_s5 + $0x460] sm:$0xff]  }
 0x36e   :  { %3462 = vmatmul.mubr.bf16.vlgmr.msra.gmra.mrb[12].mxu0 %v1190_v34  ;;  %4426 = vmatprep.subr.bf16.mxu1 %v4840_v22  ;;  %v4890_v22 = vld [vmem:[%s6360_s5 + $0x4e0] sm:$0xff]  }
 0x36f   :  { %4405 = vmatpush3.bf16.msra.mxu0 %v4839_v26  ;;  %3541 = vmatprep.mubr.bf16.mxu0 %v1195_v37  ;;  %v4889_v26 = vld [vmem:[%s6360_s5 + $0x420] sm:$0xff]   ;;  %v4893_v37 = vld [vmem:[%s6360_s5 + $0x428] sm:$0xff]  }
 0x370   :  { %3502 = vmatmul.mubr.bf16.vlgmr.msra.gmra.mrb[20].mxu1 %v1192_v39  ;;  %4406 = vmatprep.subr.bf16.mxu0 %v4843_v35  ;;  %v4891_v34 = vld [vmem:[%s6360_s5 + $0x4a0] sm:$0xff]   ;;  %v4894_v35 = vld [vmem:[%s6360_s5 + $0x4e8] sm:$0xff]  }
 0x371   :  { %4427 = vmatpush3.bf16.msra.mxu1 %v4841_v38  ;;  %3581 = vmatprep.mubr.bf16.mxu1 %v1197_v41  ;;  %v4896_v38 = vld [vmem:[%s6360_s5 + $0x470] sm:$0xff]   ;;  %v1003_v39 = vld [vmem:[#allocation4 + $0x28] sm:$0xff] }
 0x372   :  { %4428 = vmatprep.subr.bf16.mxu1 %v4845_v40  ;;  %v4895_v40 = vld [vmem:[%s6360_s5 + $0x4a8] sm:$0xff]   ;;  %v4898_v41 = vld [vmem:[%s6360_s5 + $0x4f0] sm:$0xff]  }
 0x373   :  { %4407 = vmatpush3.bf16.msra.mxu0 %v4844_v36  ;;  %v4897_v36 = vld [vmem:[%s6360_s5 + $0x430] sm:$0xff]  }
 0x374   :  { %4408 = vmatprep.subr.bf16.mxu0 %v4847_v42  ;;  %v1099_v42 = vcombine.high %v1003_v39, %v1003_v39 }
 0x375   :  { %4429 = vmatpush3.bf16.msra.mxu1 %v4846_v43  ;;  %v4900_v43 = vld [vmem:[%s6360_s5 + $0x478] sm:$0xff]  }
 0x376   :  { %4430 = vmatprep.subr.bf16.mxu1 %v4849_v44  ;;  %v4899_v44 = vld [vmem:[%s6360_s5 + $0x4b0] sm:$0xff]  }
 0x377   :  { %4409 = vmatpush3.bf16.msra.mxu0 %v4848_v45  ;;  %v5992_v45 = vrot.slane %v1003_v39, %v5478_v10 }
 0x378   :  { %4410 = vmatprep.subr.bf16.mxu0 %v4851_v46  ;;  %v4902_v46 = vld [vmem:[%s6360_s5 + $0x4f8] sm:$0xff]  }
 0x379   :  { %4431 = vmatpush3.bf16.msra.mxu1 %v4850_v48  ;;  %v4901_v48 = vld [vmem:[%s6360_s5 + $0x438] sm:$0xff]  }
 0x37a   :  { %4432 = vmatprep.subr.bf16.mxu1 %v4853_v49  ;;  %v6001_v49 = vrot.slane %v1099_v42, %v5478_v10  ;;  %v4946_v42 = vld [vmem:[%s6360_s5 + $0x650] sm:$0xff]  }
 0x37b   :  { %4411 = vmatpush3.bf16.msra.mxu0 %v4852_v50  ;;  %v4904_v50 = vld [vmem:[%s6360_s5 + $0x540] sm:$0xff]  }
 0x37c   :  { %4412 = vmatprep.subr.bf16.mxu0 %v4855_v51  ;;  %v4903_v51 = vld [vmem:[%s6360_s5 + $0x4b8] sm:$0xff]   ;;  %v1204_v39 = vpack.c.bf16 %v6001_v49, %v6001_v49 }
 0x37d   :  { %4433 = vmatpush3.bf16.msra.mxu1 %v4854_v53  ;;  %v1114_v53 = vcombine.high %v5992_v45, %v5992_v45 }
 0x37e   :  { %4434 = vmatprep.subr.bf16.mxu1 %v4857_v52  ;;  %v4906_v52 = vld [vmem:[%s6360_s5 + $0x5c0] sm:$0xff]  }
 0x37f   :  { %4413 = vmatpush3.bf16.msra.mxu0 %v4856_v54  ;;  %v4905_v54 = vld [vmem:[%s6360_s5 + $0x500] sm:$0xff]  }
 0x380   :  { %4414 = vmatprep.subr.bf16.mxu0 %v4859_v55  ;;  %v1115_v55 = vcombine.high %v6001_v49, %v6001_v49  ;;  %v4952_v49 = vld [vmem:[%s6360_s5 + $0x6d8] sm:$0xff]  }
 0x381   :  { %4435 = vmatpush3.bf16.msra.mxu1 %v4858_v57  ;;  %v1198_v57 = vpack.c.bf16 %v5882_v1, %v5882_v1  ;;  %v4914_v1 = vld [vmem:[%s6360_s5 + $0x510] sm:$0xff]  }
 0x382   :  { %4436 = vmatprep.subr.bf16.mxu1 %v4861_v56  ;;  %v4909_v56 = vld [vmem:[%s6360_s5 + $0x548] sm:$0xff]  }
 0x383   :  { %4415 = vmatpush3.bf16.msra.mxu0 %v4860_v58  ;;  %v1203_v58 = vpack.c.bf16 %v1114_v53, %v1114_v53  ;;  %v4953_v53 = vld [vmem:[%s6360_s5 + $0x698] sm:$0xff]  }
 0x384   :  { %4416 = vmatprep.subr.bf16.mxu0 %v4863_v59  ;;  %v4907_v59 = vld [vmem:[%s6360_s5 + $0x580] sm:$0xff]  }
 0x385   :  { %4437 = vmatpush3.bf16.msra.mxu1 %v4862_v60  ;;  %v4911_v60 = vld [vmem:[%s6360_s5 + $0x5c8] sm:$0xff]  }
 0x386   :  { %4438 = vmatprep.subr.bf16.mxu1 %v4865_v61  ;;  %v1205_v61 = vpack.c.bf16 %v1115_v55, %v1115_v55  ;;  %v4958_v55 = vld [vmem:[%s6360_s5 + $0x668] sm:$0xff]  }
 0x387   :  { %4417 = vmatpush3.bf16.msra.mxu0 %v4864_v62  ;;  %v4910_v62 = vld [vmem:[%s6360_s5 + $0x508] sm:$0xff]  }
 0x388   :  { %4418 = vmatprep.subr.bf16.mxu0 %v4867_v7  ;;  %v4912_v7 = vld [vmem:[%s6360_s5 + $0x588] sm:$0xff]  }
 0x389   :  { %4439 = vmatpush3.bf16.msra.mxu1 %v4866_v0  ;;  %v4915_v0 = vld [vmem:[%s6360_s5 + $0x5d0] sm:$0xff]  }
 0x38a   :  { %4440 = vmatprep.subr.bf16.mxu1 %v4869_v2  ;;  %v4917_v2 = vld [vmem:[%s6360_s5 + $0x558] sm:$0xff]  }
 0x38b   :  { %4419 = vmatpush3.bf16.msra.mxu0 %v4868_v3  ;;  %v4916_v3 = vld [vmem:[%s6360_s5 + $0x590] sm:$0xff]  }
 0x38c   :  { %4448 = vmatprep.subr.bf16.mxu0 %v4871_v12  ;;  %v4918_v12 = vld [vmem:[%s6360_s5 + $0x518] sm:$0xff]  }
 0x38d   :  { %4441 = vmatpush3.bf16.msra.mxu1 %v4870_v13  ;;  %v4921_v13 = vld [vmem:[%s6360_s5 + $0x560] sm:$0xff]  }
 0x38e   :  { %3542 = vmatmul.mubr.bf16.vlgmr.msra.gmra.mrb[16].mxu0 %v1194_v18  ;;  %4470 = vmatprep.subr.bf16.mxu1 %v4873_v4  ;;  %v4923_v4 = vld [vmem:[%s6360_s5 + $0x5e0] sm:$0xff]  }
 0x38f   :  { %4449 = vmatpush3.bf16.msra.mxu0 %v4872_v14  ;;  %3621 = vmatprep.mubr.bf16.mxu0 %v1199_v20  ;;  %v4922_v14 = vld [vmem:[%s6360_s5 + $0x520] sm:$0xff]   ;;  %v4926_v20 = vld [vmem:[%s6360_s5 + $0x528] sm:$0xff]  }
 0x390   :  { %3582 = vmatmul.mubr.bf16.vlgmr.msra.gmra.mrb[24].mxu1 %v1196_v6  ;;  %4450 = vmatprep.subr.bf16.mxu0 %v4876_v19  ;;  %v4924_v18 = vld [vmem:[%s6360_s5 + $0x5a0] sm:$0xff]   ;;  %v4927_v19 = vld [vmem:[%s6360_s5 + $0x5e8] sm:$0xff]   ;;  %v1004_v6 = vld [vmem:[#allocation4 + $0x30] sm:$0xff] }
 0x391   :  { %4471 = vmatpush3.bf16.msra.mxu1 %v4874_v8  ;;  %3661 = vmatprep.mubr.bf16.mxu1 %v1201_v9  ;;  %v4929_v8 = vld [vmem:[%s6360_s5 + $0x570] sm:$0xff]  }
 0x392   :  { %4472 = vmatprep.subr.bf16.mxu1 %v4878_v16  ;;  %v4928_v16 = vld [vmem:[%s6360_s5 + $0x5a8] sm:$0xff]   ;;  %v4931_v9 = vld [vmem:[%s6360_s5 + $0x5f0] sm:$0xff]  }
 0x393   :  { %4451 = vmatpush3.bf16.msra.mxu0 %v4877_v17  ;;  %v4930_v17 = vld [vmem:[%s6360_s5 + $0x530] sm:$0xff]  }
 0x394   :  { %4452 = vmatprep.subr.bf16.mxu0 %v4880_v21  ;;  %v1116_v21 = vcombine.high %v1004_v6, %v1004_v6 }
 0x395   :  { %4473 = vmatpush3.bf16.msra.mxu1 %v4879_v23  ;;  %v4933_v23 = vld [vmem:[%s6360_s5 + $0x578] sm:$0xff]  }
 0x396   :  { %4474 = vmatprep.subr.bf16.mxu1 %v4882_v24  ;;  %v4932_v24 = vld [vmem:[%s6360_s5 + $0x5b0] sm:$0xff]  }
 0x397   :  { %4453 = vmatpush3.bf16.msra.mxu0 %v4881_v25  ;;  %v6102_v25 = vrot.slane %v1004_v6, %v5478_v10  ;;  %v4977_v6 = vld [vmem:[%s6360_s5 + $0x7c8] sm:$0xff]  }
 0x398   :  { %4454 = vmatprep.subr.bf16.mxu0 %v4884_v27  ;;  %v4935_v27 = vld [vmem:[%s6360_s5 + $0x5f8] sm:$0xff]  }
 0x399   :  { %4475 = vmatpush3.bf16.msra.mxu1 %v4883_v28  ;;  %v4934_v28 = vld [vmem:[%s6360_s5 + $0x538] sm:$0xff]  }
 0x39a   :  { %4476 = vmatprep.subr.bf16.mxu1 %v4886_v29  ;;  %v6111_v29 = vrot.slane %v1116_v21, %v5478_v10  ;;  %v4978_v21 = vld [vmem:[%s6360_s5 + $0x788] sm:$0xff]  }
 0x39b   :  { %4455 = vmatpush3.bf16.msra.mxu0 %v4885_v30  ;;  %v4937_v30 = vld [vmem:[%s6360_s5 + $0x640] sm:$0xff]  }
 0x39c   :  { %4456 = vmatprep.subr.bf16.mxu0 %v4888_v31  ;;  %v4936_v31 = vld [vmem:[%s6360_s5 + $0x5b8] sm:$0xff]  }
 0x39d   :  { %4477 = vmatpush3.bf16.msra.mxu1 %v4887_v32  ;;  %v1131_v32 = vcombine.high %v6102_v25, %v6102_v25 }
 0x39e   :  { %4478 = vmatprep.subr.bf16.mxu1 %v4890_v22  ;;  %v4939_v22 = vld [vmem:[%s6360_s5 + $0x6c0] sm:$0xff]  }
 0x39f   :  { %4457 = vmatpush3.bf16.msra.mxu0 %v4889_v26  ;;  %v4938_v26 = vld [vmem:[%s6360_s5 + $0x600] sm:$0xff]  }
 0x3a0   :  { %4458 = vmatprep.subr.bf16.mxu0 %v4892_v33  ;;  %v1132_v33 = vcombine.high %v6111_v29, %v6111_v29 }
 0x3a1   :  { %4479 = vmatpush3.bf16.msra.mxu1 %v4891_v34  ;;  %v1202_v34 = vpack.c.bf16 %v5992_v45, %v5992_v45  ;;  %v4947_v45 = vld [vmem:[%s6360_s5 + $0x610] sm:$0xff]  }
 0x3a2   :  { %4480 = vmatprep.subr.bf16.mxu1 %v4894_v35  ;;  %v4942_v35 = vld [vmem:[%s6360_s5 + $0x648] sm:$0xff]  }
 0x3a3   :  { %4459 = vmatpush3.bf16.msra.mxu0 %v4893_v37  ;;  %v1207_v37 = vpack.c.bf16 %v1131_v32, %v1131_v32  ;;  %v4989_v32 = vld [vmem:[%s6360_s5 + $0x7e0] sm:$0xff]  }
 0x3a4   :  { %4460 = vmatprep.subr.bf16.mxu0 %v4896_v38  ;;  %v4940_v38 = vld [vmem:[%s6360_s5 + $0x680] sm:$0xff]  }
 0x3a5   :  { %4481 = vmatpush3.bf16.msra.mxu1 %v4895_v40  ;;  %v4944_v40 = vld [vmem:[%s6360_s5 + $0x6c8] sm:$0xff]  }
 0x3a6   :  { %4482 = vmatprep.subr.bf16.mxu1 %v4898_v41  ;;  %v1209_v41 = vpack.c.bf16 %v1132_v33, %v1132_v33  ;;  %v4990_v33 = vld [vmem:[%s6360_s5 + $0x7a0] sm:$0xff]  }
 0x3a7   :  { %4461 = vmatpush3.bf16.msra.mxu0 %v4897_v36  ;;  %v4943_v36 = vld [vmem:[%s6360_s5 + $0x608] sm:$0xff]  }
 0x3a8   :  { %4462 = vmatprep.subr.bf16.mxu0 %v4900_v43  ;;  %v4945_v43 = vld [vmem:[%s6360_s5 + $0x688] sm:$0xff]  }
 0x3a9   :  { %4483 = vmatpush3.bf16.msra.mxu1 %v4899_v44  ;;  %v4948_v44 = vld [vmem:[%s6360_s5 + $0x6d0] sm:$0xff]  }
 0x3aa   :  { %4484 = vmatprep.subr.bf16.mxu1 %v4902_v46  ;;  %v4950_v46 = vld [vmem:[%s6360_s5 + $0x658] sm:$0xff]  }
 0x3ab   :  { %4463 = vmatpush3.bf16.msra.mxu0 %v4901_v48  ;;  %v4949_v48 = vld [vmem:[%s6360_s5 + $0x690] sm:$0xff]  }
 0x3ac   :  { %4492 = vmatprep.subr.bf16.mxu0 %v4904_v50  ;;  %v4951_v50 = vld [vmem:[%s6360_s5 + $0x618] sm:$0xff]  }
 0x3ad   :  { %4485 = vmatpush3.bf16.msra.mxu1 %v4903_v51  ;;  %v4954_v51 = vld [vmem:[%s6360_s5 + $0x660] sm:$0xff]  }
 0x3ae   :  { %3622 = vmatmul.mubr.bf16.vlgmr.msra.gmra.mrb[20].mxu0 %v1198_v57  ;;  %4514 = vmatprep.subr.bf16.mxu1 %v4906_v52  ;;  %v4956_v52 = vld [vmem:[%s6360_s5 + $0x6e0] sm:$0xff]  }
 0x3af   :  { %4493 = vmatpush3.bf16.msra.mxu0 %v4905_v54  ;;  %3701 = vmatprep.mubr.bf16.mxu0 %v1203_v58  ;;  %v4955_v54 = vld [vmem:[%s6360_s5 + $0x620] sm:$0xff]   ;;  %v4959_v58 = vld [vmem:[%s6360_s5 + $0x628] sm:$0xff]  }
 0x3b0   :  { %3662 = vmatmul.mubr.bf16.vlgmr.msra.gmra.mrb[28].mxu1 %v1200_v47  ;;  %4494 = vmatprep.subr.bf16.mxu0 %v4909_v56  ;;  %v4957_v57 = vld [vmem:[%s6360_s5 + $0x6a0] sm:$0xff]   ;;  %v4960_v56 = vld [vmem:[%s6360_s5 + $0x6e8] sm:$0xff]   ;;  %v1005_v47 = vld [vmem:[#allocation4 + $0x38] sm:$0xff] }
 0x3b1   :  { %4515 = vmatpush3.bf16.msra.mxu1 %v4907_v59  ;;  %3741 = vmatprep.mubr.bf16.mxu1 %v1205_v61  ;;  %v4962_v59 = vld [vmem:[%s6360_s5 + $0x670] sm:$0xff]  }
 0x3b2   :  { %4516 = vmatprep.subr.bf16.mxu1 %v4911_v60  ;;  %v4961_v60 = vld [vmem:[%s6360_s5 + $0x6a8] sm:$0xff]   ;;  %v4964_v61 = vld [vmem:[%s6360_s5 + $0x6f0] sm:$0xff]  }
 0x3b3   :  { %4495 = vmatpush3.bf16.msra.mxu0 %v4910_v62  ;;  %v4963_v62 = vld [vmem:[%s6360_s5 + $0x630] sm:$0xff]  }
 0x3b4   :  { %4496 = vmatprep.subr.bf16.mxu0 %v4913_v63  ;;  %v1133_v63 = vcombine.high %v1005_v47, %v1005_v47 }
 0x3b5   :  { %4517 = vmatpush3.bf16.msra.mxu1 %v4912_v7  ;;  %v4966_v7 = vld [vmem:[%s6360_s5 + $0x678] sm:$0xff]  }
 0x3b6   :  { %4518 = vmatprep.subr.bf16.mxu1 %v4915_v0  ;;  %v4965_v0 = vld [vmem:[%s6360_s5 + $0x6b0] sm:$0xff]  }
 0x3b7   :  { %4497 = vmatpush3.bf16.msra.mxu0 %v4914_v1  ;;  %v6212_v1 = vrot.slane %v1005_v47, %v5478_v10 }
 0x3b8   :  { %4498 = vmatprep.subr.bf16.mxu0 %v4917_v2  ;;  %v4968_v2 = vld [vmem:[%s6360_s5 + $0x6f8] sm:$0xff]  }
 0x3b9   :  { %4519 = vmatpush3.bf16.msra.mxu1 %v4916_v3  ;;  %v4967_v3 = vld [vmem:[%s6360_s5 + $0x638] sm:$0xff]  }
 0x3ba   :  { %4520 = vmatprep.subr.bf16.mxu1 %v4919_v11  ;;  %v6221_v11 = vrot.slane %v1133_v63, %v5478_v10  ;;  %v4971_v10 = vld [vmem:[%s6360_s5 + $0x700] sm:$0xff]  }
 0x3bb   :  { %4499 = vmatpush3.bf16.msra.mxu0 %v4918_v12  ;;  %v4970_v12 = vld [vmem:[%s6360_s5 + $0x740] sm:$0xff]  }
 0x3bc   :  { %4500 = vmatprep.subr.bf16.mxu0 %v4921_v13  ;;  %v4969_v13 = vld [vmem:[%s6360_s5 + $0x6b8] sm:$0xff]   ;;  %v1212_v47 = vpack.c.bf16 %v6221_v11, %v6221_v11 }
 0x3bd   :  { %4521 = vmatpush3.bf16.msra.mxu1 %v4920_v5  ;;  %v1148_v5 = vcombine.high %v6212_v1, %v6212_v1 }
 0x3be   :  { %4522 = vmatprep.subr.bf16.mxu1 %v4923_v4  ;;  %v4972_v4 = vld [vmem:[%s6360_s5 + $0x7c0] sm:$0xff]  }
 0x3bf   :  { %4501 = vmatpush3.bf16.msra.mxu0 %v4922_v14  ;;  %v1149_v14 = vcombine.high %v6221_v11, %v6221_v11 }
 0x3c0   :  { %4502 = vmatprep.subr.bf16.mxu0 %v4925_v15  ;;  %v1206_v15 = vpack.c.bf16 %v6102_v25, %v6102_v25  ;;  %v4983_v25 = vld [vmem:[%s6360_s5 + $0x758] sm:$0xff]  }
 0x3c1   :  { %4523 = vmatpush3.bf16.msra.mxu1 %v4924_v18  ;;  %v4975_v18 = vld [vmem:[%s6360_s5 + $0x748] sm:$0xff]  }
 0x3c2   :  { %4524 = vmatprep.subr.bf16.mxu1 %v4927_v19  ;;  %v1211_v19 = vpack.c.bf16 %v1148_v5, %v1148_v5 }
 0x3c3   :  { %4503 = vmatpush3.bf16.msra.mxu0 %v4926_v20  ;;  %v4973_v20 = vld [vmem:[%s6360_s5 + $0x780] sm:$0xff]  }
 0x3c4   :  { %4504 = vmatprep.subr.bf16.mxu0 %v4929_v8  ;;  %v1208_v8 = vpack.c.bf16 %v6111_v29, %v6111_v29  ;;  %v4984_v29 = vld [vmem:[%s6360_s5 + $0x718] sm:$0xff]  }
 0x3c5   :  { %4525 = vmatpush3.bf16.msra.mxu1 %v4928_v16  ;;  %v1213_v16 = vpack.c.bf16 %v1149_v14, %v1149_v14 }
 0x3c6   :  { %4526 = vmatprep.subr.bf16.mxu1 %v4931_v9  ;;  %v4976_v9 = vld [vmem:[%s6360_s5 + $0x708] sm:$0xff]  }
 0x3c7   :  { %4505 = vmatpush3.bf16.msra.mxu0 %v4930_v17  ;;  %v4979_v17 = vld [vmem:[%s6360_s5 + $0x750] sm:$0xff]  }
 0x3c8   :  { %4506 = vmatprep.subr.bf16.mxu0 %v4933_v23  ;;  %v4981_v23 = vld [vmem:[%s6360_s5 + $0x7d0] sm:$0xff]  }
 0x3c9   :  { %4527 = vmatpush3.bf16.msra.mxu1 %v4932_v24  ;;  %v4980_v24 = vld [vmem:[%s6360_s5 + $0x710] sm:$0xff]  }
 0x3ca   :  { %4528 = vmatprep.subr.bf16.mxu1 %v4935_v27  ;;  %v4982_v27 = vld [vmem:[%s6360_s5 + $0x790] sm:$0xff]  }
 0x3cb   :  { %4507 = vmatpush3.bf16.msra.mxu0 %v4934_v28  ;;  %v4985_v28 = vld [vmem:[%s6360_s5 + $0x7d8] sm:$0xff]  }
 0x3cc   :  { %4536 = vmatprep.subr.bf16.mxu0 %v4937_v30  ;;  %v4987_v30 = vld [vmem:[%s6360_s5 + $0x760] sm:$0xff]  }
 0x3cd   :  { %4529 = vmatpush3.bf16.msra.mxu1 %v4936_v31  ;;  %v4986_v31 = vld [vmem:[%s6360_s5 + $0x798] sm:$0xff]  }
 0x3ce   :  { %3702 = vmatmul.mubr.bf16.vlgmr.msra.gmra.mrb[24].mxu0 %v1202_v34  ;;  %4558 = vmatprep.subr.bf16.mxu1 %v4939_v22  ;;  %v4988_v22 = vld [vmem:[%s6360_s5 + $0x720] sm:$0xff]   ;;  %v4993_v34 = vld [vmem:[%s6360_s5 + $0x7e8] sm:$0xff]  }
 0x3cf   :  { %4537 = vmatpush3.bf16.msra.mxu0 %v4938_v26  ;;  %3781 = vmatprep.mubr.bf16.mxu0 %v1207_v37  ;;  %v4991_v26 = vld [vmem:[%s6360_s5 + $0x768] sm:$0xff]   ;;  %v4995_v37 = vld [vmem:[%s6360_s5 + $0x770] sm:$0xff]  }
 0x3d0   :  { %3742 = vmatmul.mubr.bf16.vlgmr.msra.gmra.mrb[32].mxu1 %v1204_v39  ;;  %4538 = vmatprep.subr.bf16.mxu0 %v4942_v35  ;;  %v4992_v35 = vld [vmem:[%s6360_s5 + $0x728] sm:$0xff]  }
 0x3d1   :  { %4559 = vmatpush3.bf16.msra.mxu1 %v4940_v38  ;;  %3821 = vmatprep.mubr.bf16.mxu1 %v1209_v41  ;;  %v4994_v39 = vld [vmem:[%s6360_s5 + $0x7a8] sm:$0xff]  }
 0x3d2   :  { %4560 = vmatprep.subr.bf16.mxu1 %v4944_v40  ;;  %v4009_v40 = vld [vmem:[%s6361_s6] ss:$0 sm:$0xff] }
 0x3d3   :  { %4539 = vmatpush3.bf16.msra.mxu0 %v4943_v36  ;;  %v4997_v36 = vld [vmem:[%s6360_s5 + $0x7f0] sm:$0xff]  }
 0x3d4   :  { %4540 = vmatprep.subr.bf16.mxu0 %v4946_v42 }
 0x3d5   :  { %4561 = vmatpush3.bf16.msra.mxu1 %v4945_v43 }
 0x3d6   :  { %4562 = vmatprep.subr.bf16.mxu1 %v4948_v44 }
 0x3d7   :  { %4541 = vmatpush3.bf16.msra.mxu0 %v4947_v45  ;;  %v4996_v45 = vld [vmem:[%s6360_s5 + $0x730] sm:$0xff]  }
 0x3d8   :  { %4542 = vmatprep.subr.bf16.mxu0 %v4950_v46 }
 0x3d9   :  { %4563 = vmatpush3.bf16.msra.mxu1 %v4949_v48 }
 0x3da   :  { %4564 = vmatprep.subr.bf16.mxu1 %v4952_v49  ;;  %v4999_v49 = vld [vmem:[%s6360_s5 + $0x778] sm:$0xff]  }
 0x3db   :  { %4543 = vmatpush3.bf16.msra.mxu0 %v4951_v50 }
 0x3dc   :  { %4544 = vmatprep.subr.bf16.mxu0 %v4954_v51 }
 0x3dd   :  { %4565 = vmatpush3.bf16.msra.mxu1 %v4953_v53 }
 0x3de   :  { %4566 = vmatprep.subr.bf16.mxu1 %v4956_v52  ;;  %v4998_v52 = vld [vmem:[%s6360_s5 + $0x7b0] sm:$0xff]  }
 0x3df   :  { %4545 = vmatpush3.bf16.msra.mxu0 %v4955_v54 }
 0x3e0   :  { %4546 = vmatprep.subr.bf16.mxu0 %v4958_v55  ;;  %v5001_v55 = vld [vmem:[%s6360_s5 + $0x7f8] sm:$0xff]  }
 0x3e1   :  { %4567 = vmatpush3.bf16.msra.mxu1 %v4957_v57 }
 0x3e2   :  { %4568 = vmatprep.subr.bf16.mxu1 %v4960_v56  ;;  %v5000_v56 = vld [vmem:[%s6360_s5 + $0x738] sm:$0xff]  }
 0x3e3   :  { %4547 = vmatpush3.bf16.msra.mxu0 %v4959_v58  ;;  %v5002_v58 = vld [vmem:[%s6360_s5 + $0x7b8] sm:$0xff]  }
 0x3e4   :  { %4548 = vmatprep.subr.bf16.mxu0 %v4962_v59  ;;  %v1210_v59 = vpack.c.bf16 %v6212_v1, %v6212_v1 }
 0x3e5   :  { %4569 = vmatpush3.bf16.msra.mxu1 %v4961_v60 }
 0x3e6   :  { %4570 = vmatprep.subr.bf16.mxu1 %v4964_v61 }
 0x3e7   :  { %4549 = vmatpush3.bf16.msra.mxu0 %v4963_v62 }
 0x3e8   :  { %4550 = vmatprep.subr.bf16.mxu0 %v4966_v7 }
 0x3e9   :  { %4571 = vmatpush3.bf16.msra.mxu1 %v4965_v0 }
 0x3ea   :  { %4572 = vmatprep.subr.bf16.mxu1 %v4968_v2 }
 0x3eb   :  { %4551 = vmatpush3.bf16.msra.mxu0 %v4967_v3 }
 0x3ec   :  { %4580 = vmatprep.subr.bf16.mxu0 %v4970_v12 }
 0x3ed   :  { %4573 = vmatpush3.bf16.msra.mxu1 %v4969_v13 }
 0x3ee   :  { %3782 = vmatmul.mubr.bf16.vlgmr.msra.gmra.mrb[28].mxu0 %v1206_v15  ;;  %4602 = vmatprep.subr.bf16.mxu1 %v4972_v4 }
 0x3ef   :  { %4581 = vmatpush3.bf16.msra.mxu0 %v4971_v10  ;;  %3861 = vmatprep.mubr.bf16.mxu0 %v1211_v19 }
 0x3f0   :  { %3822 = vmatmul.mubr.bf16.vlgmr.msra.gmra.mrb[36].mxu1 %v1208_v8  ;;  %4582 = vmatprep.subr.bf16.mxu0 %v4975_v18 }
 0x3f1   :  { %4603 = vmatpush3.bf16.msra.mxu1 %v4973_v20  ;;  %3901 = vmatprep.mubr.bf16.mxu1 %v1213_v16 }
 0x3f2   :  { %4604 = vmatprep.subr.bf16.mxu1 %v4977_v6 }
 0x3f3   :  { %4583 = vmatpush3.bf16.msra.mxu0 %v4976_v9 }
 0x3f4   :  { %4584 = vmatprep.subr.bf16.mxu0 %v4979_v17  ;;  %v5018_v17 = vmov 0.0  }
 0x3f5   :  { %4605 = vmatpush3.bf16.msra.mxu1 %v4978_v21  ;;  %v5003_v21 = vld [vmem:[%s6362_s7] sm:$0xff]  }
 0x3f6   :  { %4606 = vmatprep.subr.bf16.mxu1 %v4981_v23 }
 0x3f7   :  { %4585 = vmatpush3.bf16.msra.mxu0 %v4980_v24 }
 0x3f8   :  { %4586 = vmatprep.subr.bf16.mxu0 %v4983_v25 }
 0x3f9   :  { %4607 = vmatpush3.bf16.msra.mxu1 %v4982_v27 }
 0x3fa   :  { %4608 = vmatprep.subr.bf16.mxu1 %v4985_v28 }
 0x3fb   :  { %4587 = vmatpush3.bf16.msra.mxu0 %v4984_v29 }
 0x3fc   :  { %4588 = vmatprep.subr.bf16.mxu0 %v4987_v30 }
 0x3fd   :  { %4609 = vmatpush3.bf16.msra.mxu1 %v4986_v31 }
 0x3fe   :  { %4610 = vmatprep.subr.bf16.mxu1 %v4989_v32 }
 0x3ff   :  { %4589 = vmatpush3.bf16.msra.mxu0 %v4988_v22 }
 0x400   :  { %4590 = vmatprep.subr.bf16.mxu0 %v4991_v26  ;;  %v5004_v26 = vld [vmem:[%s6362_s7 + $0x8] sm:$0xff]  }
 0x401   :  { %4611 = vmatpush3.bf16.msra.mxu1 %v4990_v33  ;;  %v4288_v38 = vpop.f32.mrb[4].mxu0 }
 0x402   :  { %v4289_v41 = vpop.f32.mrb[5].mxu0  ;;  %4612 = vmatprep.subr.bf16.mxu1 %v4993_v34 }
 0x403   :  { %v4290_v42 = vadd.f32 %v4289_v41, %v4288_v38  ;;  %4591 = vmatpush3.bf16.msra.mxu0 %v4992_v35  ;;  %v4291_v43 = vpop.f32.mrb[6].mxu0  ;;  %v4310_v44 = vpop.f32.mrb[12].mxu1  ;;  %v5005_v35 = vld [vmem:[%s6362_s7 + $0x10] sm:$0xff]  }
 0x404   :  { %v4292_v46 = vpop.f32.mrb[7].mxu0  ;;  %v4311_v48 = vpop.f32.mrb[13].mxu1  ;;  %4592 = vmatprep.subr.bf16.mxu0 %v4995_v37  ;;  %v5006_v37 = vld [vmem:[%s6362_s7 + $0x18] sm:$0xff]  }
 0x405   :  { %v3304_v50 = vadd.f32 %v4290_v42, %v4009_v40  ;;  %v4312_v51 = vadd.f32 %v4311_v48, %v4310_v44  ;;  %4613 = vmatpush3.bf16.msra.mxu1 %v4994_v39  ;;  %v4313_v53 = vpop.f32.mrb[14].mxu1 }
 0x406   :  { %v4314_v54 = vpop.f32.mrb[15].mxu1  ;;  %4614 = vmatprep.subr.bf16.mxu1 %v4997_v36 }
 0x407   :  { %v3344_v57 = vadd.f32 %v4312_v51, %v3304_v50  ;;  %4593 = vmatpush3.bf16.msra.mxu0 %v4996_v45 }
 0x408   :  { %4594 = vmatprep.subr.bf16.mxu0 %v4999_v49 }
 0x409   :  { %4615 = vmatpush3.bf16.msra.mxu1 %v4998_v52 }
 0x40a   :  { %4616 = vmatprep.subr.bf16.mxu1 %v5001_v55 }
 0x40b   :  { %4595 = vmatpush3.bf16.msra.mxu0 %v5000_v56 }
 0x40c   :  { %4629 = vmatprep.subr.bf16.mxu0 %v5018_v17 }
 0x40d   :  { %4617 = vmatpush3.bf16.msra.mxu1 %v5002_v58 }
 0x40e   :  { %3862 = vmatmul.mubr.bf16.vlgmr.msra.gmra.mrb[32].mxu0 %v1210_v59 }
 0x40f   :  { %4630 = vmatpush3.bf16.msra.mxu0 %v5003_v21  ;;  %4637 = vmatprep.mubr.msk.bf16.mxu0 %vm5019_vm13, %v5018_v17 }
 0x410   :  { %3902 = vmatmul.mubr.bf16.vlgmr.msra.gmra.mrb[40].mxu1 %v1212_v47  ;;  %4631 = vmatprep.subr.bf16.mxu0 %v5018_v17 }
 0x413   :  { %4632 = vmatpush3.bf16.msra.mxu0 %v5004_v26 }
 0x414   :  { %4633 = vmatprep.subr.bf16.mxu0 %v5018_v17 }
 0x417   :  { %4634 = vmatpush3.bf16.msra.mxu0 %v5005_v35 }
 0x418   :  { %4635 = vmatprep.subr.bf16.mxu0 %v5018_v17 }
 0x41b   :  { %4636 = vmatpush3.bf16.msra.mxu0 %v5006_v37 }
 0x421   :  { %v4332_v60 = vpop.f32.mrb[8].mxu0 }
 0x422   :  { %v4333_v61 = vpop.f32.mrb[9].mxu0 }
 0x423   :  { %v4334_v62 = vadd.f32 %v4333_v61, %v4332_v60  ;;  %v4335_v63 = vpop.f32.mrb[10].mxu0  ;;  %v4354_v7 = vpop.f32.mrb[16].mxu1 }
 0x424   :  { %v4336_v0 = vpop.f32.mrb[11].mxu0  ;;  %v4355_v2 = vpop.f32.mrb[17].mxu1 }
 0x425   :  { %v3384_v3 = vadd.f32 %v4334_v62, %v3344_v57  ;;  %v4356_v12 = vadd.f32 %v4355_v2, %v4354_v7  ;;  %v4357_v13 = vpop.f32.mrb[18].mxu1 }
 0x426   :  { %v4358_v5 = vpop.f32.mrb[19].mxu1 }
 0x427   :  { %v3424_v4 = vadd.f32 %v4356_v12, %v3384_v3 }
 0x441   :  { %v4376_v10 = vpop.f32.mrb[12].mxu0 }
 0x442   :  { %v4377_v1 = vpop.f32.mrb[13].mxu0 }
 0x443   :  { %v4378_v14 = vadd.f32 %v4377_v1, %v4376_v10  ;;  %v4379_v15 = vpop.f32.mrb[14].mxu0  ;;  %v4398_v18 = vpop.f32.mrb[20].mxu1 }
 0x444   :  { %v4380_v19 = vpop.f32.mrb[15].mxu0  ;;  %v4399_v11 = vpop.f32.mrb[21].mxu1 }
 0x445   :  { %v3464_v20 = vadd.f32 %v4378_v14, %v3424_v4  ;;  %v4400_v8 = vadd.f32 %v4399_v11, %v4398_v18  ;;  %v4401_v6 = vpop.f32.mrb[22].mxu1 }
 0x446   :  { %v4402_v16 = vpop.f32.mrb[23].mxu1 }
 0x447   :  { %v3504_v9 = vadd.f32 %v4400_v8, %v3464_v20 }
 0x461   :  { %v4420_v23 = vpop.f32.mrb[16].mxu0 }
 0x462   :  { %v4421_v24 = vpop.f32.mrb[17].mxu0 }
 0x463   :  { %v4422_v25 = vadd.f32 %v4421_v24, %v4420_v23  ;;  %v4423_v27 = vpop.f32.mrb[18].mxu0  ;;  %v4442_v28 = vpop.f32.mrb[24].mxu1  ;;  %v4266_v24 = vld [vmem:[%s6363_s8] ss:$0 sm:$0xff] }
 0x464   :  { %v4424_v29 = vpop.f32.mrb[19].mxu0  ;;  %v4443_v30 = vpop.f32.mrb[25].mxu1 }
 0x465   :  { %v3544_v31 = vadd.f32 %v4422_v25, %v3504_v9  ;;  %v4444_v32 = vadd.f32 %v4443_v30, %v4442_v28  ;;  %v4445_v22 = vpop.f32.mrb[26].mxu1 }
 0x466   :  { %v4446_v33 = vpop.f32.mrb[27].mxu1 }
 0x467   :  { %v3584_v34 = vadd.f32 %v4444_v32, %v3544_v31 }
 0x481   :  { %v4464_v38 = vpop.f32.mrb[20].mxu0 }
 0x482   :  { %v4465_v39 = vpop.f32.mrb[21].mxu0 }
 0x483   :  { %v4466_v40 = vadd.f32 %v4465_v39, %v4464_v38  ;;  %v4467_v41 = vpop.f32.mrb[22].mxu0  ;;  %v4486_v36 = vpop.f32.mrb[28].mxu1 }
 0x484   :  { %v4468_v42 = vpop.f32.mrb[23].mxu0  ;;  %v4487_v43 = vpop.f32.mrb[29].mxu1 }
 0x485   :  { %v3624_v44 = vadd.f32 %v4466_v40, %v3584_v34  ;;  %v4488_v45 = vadd.f32 %v4487_v43, %v4486_v36  ;;  %v4489_v46 = vpop.f32.mrb[30].mxu1 }
 0x486   :  { %v4490_v48 = vpop.f32.mrb[31].mxu1 }
 0x487   :  { %v3664_v49 = vadd.f32 %v4488_v45, %v3624_v44 }
 0x4a1   :  { %v4508_v50 = vpop.f32.mrb[24].mxu0 }
 0x4a2   :  { %v4509_v51 = vpop.f32.mrb[25].mxu0 }
 0x4a3   :  { %v4510_v53 = vadd.f32 %v4509_v51, %v4508_v50  ;;  %v4511_v52 = vpop.f32.mrb[26].mxu0  ;;  %v4530_v54 = vpop.f32.mrb[32].mxu1 }
 0x4a4   :  { %v4512_v55 = vpop.f32.mrb[27].mxu0  ;;  %v4531_v57 = vpop.f32.mrb[33].mxu1 }
 0x4a5   :  { %v3704_v56 = vadd.f32 %v4510_v53, %v3664_v49  ;;  %v4532_v58 = vadd.f32 %v4531_v57, %v4530_v54  ;;  %v4533_v59 = vpop.f32.mrb[34].mxu1 }
 0x4a6   :  { %v4534_v47 = vpop.f32.mrb[35].mxu1 }
 0x4a7   :  { %v3744_v60 = vadd.f32 %v4532_v58, %v3704_v56 }
 0x4c1   :  { %v4552_v61 = vpop.f32.mrb[28].mxu0 }
 0x4c2   :  { %v4553_v62 = vpop.f32.mrb[29].mxu0 }
 0x4c3   :  { %v4554_v63 = vadd.f32 %v4553_v62, %v4552_v61  ;;  %v4555_v7 = vpop.f32.mrb[30].mxu0  ;;  %v4574_v0 = vpop.f32.mrb[36].mxu1 }
 0x4c4   :  { %v4556_v2 = vpop.f32.mrb[31].mxu0  ;;  %v4575_v3 = vpop.f32.mrb[37].mxu1 }
 0x4c5   :  { %v3784_v12 = vadd.f32 %v4554_v63, %v3744_v60  ;;  %v4576_v13 = vadd.f32 %v4575_v3, %v4574_v0  ;;  %v4577_v5 = vpop.f32.mrb[38].mxu1 }
 0x4c6   :  { %v4578_v4 = vpop.f32.mrb[39].mxu1 }
 0x4c7   :  { %v3824_v10 = vadd.f32 %v4576_v13, %v3784_v12 }
 0x4e1   :  { %v4596_v1 = vpop.f32.mrb[32].mxu0 }
 0x4e2   :  { %v4597_v14 = vpop.f32.mrb[33].mxu0 }
 0x4e3   :  { %v4598_v15 = vadd.f32 %v4597_v14, %v4596_v1  ;;  %v4599_v18 = vpop.f32.mrb[34].mxu0  ;;  %v4618_v19 = vpop.f32.mrb[40].mxu1 }
 0x4e4   :  { %v4600_v11 = vpop.f32.mrb[35].mxu0  ;;  %v4619_v20 = vpop.f32.mrb[41].mxu1 }
 0x4e5   :  { %v3864_v8 = vadd.f32 %v4598_v15, %v3824_v10  ;;  %v4620_v6 = vadd.f32 %v4619_v20, %v4618_v19  ;;  %v4621_v16 = vpop.f32.mrb[42].mxu1 }
 0x4e6   :  { %v4622_v9 = vpop.f32.mrb[43].mxu1 }
 0x4e7   :  { %v3904_v17 = vadd.f32 %v4620_v6, %v3864_v8 }
 0x4e9   :  { %v3909_v21 = vmax.f32 %v3904_v17, 0.0 }
 0x4eb   :  { %v3910_v23 = vpack.c.bf16 %v3909_v21, %v3909_v21 }
 0x4ed   :  { %4638 = vmatmul.mubr.msk.bf16.vlgmr.msra.gmra.mrb[36].mxu0 %vm3950_vm14, %v3910_v23 }
 0x5c0   :  { %v3988_v25 = vpop.f32.mrb[36].mxu0 }
 0x5c1   :  { %v3989_v27 = vadd.f32 %v4266_v24, %v3988_v25  ;;  %v4639_v28 = vpop.f32.mrb[37].mxu0 }
 0x5c2   :  { %v3991_v29 = vpop.f32.mrb[38].mxu0 }
 0x5c3   :  { %3995 = vst.msk [vmem:[%s6364_s9] sm:$0x3] %vm3994_vm15, %v3989_v27  ;;  %v4640_v30 = vpop.f32.mrb[39].mxu0 }

</bundles_post_ra>
